<compile_context>
chip_gen: v6e
topology: v6e:2x2x1
jax: 0.10.0
libtpu: 0.0.40
codegen_flags: <defaults>
</compile_context>

<pallas_src>
import functools

import jax
import jax.numpy as jnp
from jax.experimental import pallas as pl
from jax.experimental.pallas import tpu as pltpu

INPUT_DIM = 1
HIDDEN_DIM1 = 180
HIDDEN_DIM2 = 300
HIDDEN_DIM3 = 120
OUTPUT_DIM = 6

LANE = 128  # TPU lane width


def _mlp_kernel(xT_ref, w1_ref, b1_ref, w2_ref, b2_ref, w3_ref, b3_ref,
                w4_ref, b4_ref, o_ref, *, apply_softmax: bool):
    # Transposed layout: activations are [features, batch_tile] (batch on lanes).
    xT = xT_ref[...]                                   # [1, tb] f32

    # Layer 1: in_features == 1 -> outer product == broadcast multiply on the VPU
    # (avoids a K=1 matmul that would be padded to K=128/256 on the MXU).
    h1 = jnp.maximum(w1_ref[...] * xT + b1_ref[...], 0.0)            # [180, tb] f32

    # Layers 2-4 on the MXU: bf16 operands, f32 accumulation.
    h2 = jnp.dot(w2_ref[...], h1.astype(jnp.bfloat16),
                 preferred_element_type=jnp.float32) + b2_ref[...]
    h2 = jnp.maximum(h2, 0.0)                                         # [300, tb] f32

    h3 = jnp.dot(w3_ref[...], h2.astype(jnp.bfloat16),
                 preferred_element_type=jnp.float32) + b3_ref[...]
    h3 = jnp.maximum(h3, 0.0)                                         # [120, tb] f32

    out = jnp.dot(w4_ref[...], h3.astype(jnp.bfloat16),
                  preferred_element_type=jnp.float32) + b4_ref[...]   # [6, tb] f32

    if apply_softmax:
        # softmax over the feature axis (axis 0 in the transposed layout)
        m = jnp.max(out, axis=0, keepdims=True)
        e = jnp.exp(out - m)
        s = jnp.sum(e, axis=0, keepdims=True)
        out = e * pl.reciprocal(s, approx=True)

    o_ref[...] = out.astype(o_ref.dtype)


def _choose_tb(Bp):
    """Largest lane-aligned batch tile (<=512) dividing the padded batch,
    preferring >= 2 grid steps so both v7x TensorCores get work."""
    for cand in (512, 256, 128):
        if Bp % cand == 0 and Bp // cand >= 2:
            return cand
    for cand in (512, 256, 128):
        if Bp % cand == 0:
            return cand
    return Bp  # unreachable: Bp is always a multiple of LANE


def pose_mlp_forward(x, params, apply_softmax=False):
    """x: [B, INPUT_DIM] float32. params: w1..w4 as [out,in], b1..b4 as [out,1]."""
    B, D = x.shape
    assert D == INPUT_DIM

    # Pad the batch up to a lane multiple so every block is lane-dense.
    Bp = max(LANE, ((B + LANE - 1) // LANE) * LANE)
    tb = _choose_tb(Bp)

    # input_dim == 1, so x.T is just a reshape -> [1, B] (batch on lanes).
    xT = x.reshape(1, B).astype(jnp.float32)
    if Bp != B:
        xT = jnp.pad(xT, ((0, 0), (0, Bp - B)))

    w1, b1 = params["w1"], params["b1"]                     # f32 [180,1], [180,1]
    # Cast MXU weights to bf16 once in the wrapper (not per grid step).
    w2 = params["w2"].astype(jnp.bfloat16)                  # [300,180]
    w3 = params["w3"].astype(jnp.bfloat16)                  # [120,300]
    w4 = params["w4"].astype(jnp.bfloat16)                  # [  6,120]
    b2, b3, b4 = params["b2"], params["b3"], params["b4"]   # f32 [out,1]

    def full_spec(arr):
        # Weights/biases: whole array, constant block index -> stays resident in VMEM.
        return pl.BlockSpec(arr.shape, lambda i: (0, 0))

    kernel = functools.partial(_mlp_kernel, apply_softmax=apply_softmax)

    outT = pl.pallas_call(
        kernel,
        out_shape=jax.ShapeDtypeStruct((OUTPUT_DIM, Bp), jnp.float32),
        grid_spec=pltpu.PrefetchScalarGridSpec(
            num_scalar_prefetch=0,
            grid=(Bp // tb,),
            in_specs=[
                pl.BlockSpec((1, tb), lambda i: (0, i)),
                full_spec(w1), full_spec(b1),
                full_spec(w2), full_spec(b2),
                full_spec(w3), full_spec(b3),
                full_spec(w4), full_spec(b4),
            ],
            out_specs=pl.BlockSpec((OUTPUT_DIM, tb), lambda i: (0, i)),
        ),
        compiler_params=pltpu.CompilerParams(
            dimension_semantics=("parallel",)),
    )(xT, w1, b1, w2, b2, w3, b3, w4, b4)

    return outT[:, :B].T  # back to [B, OUTPUT_DIM]


def init_params(key):
    """Deterministic init mimicking nn.Linear (uniform +/- 1/sqrt(fan_in)).
    Weights stored in PyTorch layout [out_features, in_features], biases [out,1]."""
    dims = [INPUT_DIM, HIDDEN_DIM1, HIDDEN_DIM2, HIDDEN_DIM3, OUTPUT_DIM]
    params = {}
    for idx in range(4):
        fan_in, fan_out = dims[idx], dims[idx + 1]
        key, kw, kb = jax.random.split(key, 3)
        bound = 1.0 / (fan_in ** 0.5)
        params[f"w{idx + 1}"] = jax.random.uniform(
            kw, (fan_out, fan_in), jnp.float32, -bound, bound)
        params[f"b{idx + 1}"] = jax.random.uniform(
            kb, (fan_out, 1), jnp.float32, -bound, bound)
    return params


def reference_forward(x, params, apply_softmax=False):
    """Pure-JAX f32 reference matching the PyTorch module."""
    h = jnp.maximum(x @ params["w1"].T + params["b1"].T, 0.0)
    h = jnp.maximum(h @ params["w2"].T + params["b2"].T, 0.0)
    h = jnp.maximum(h @ params["w3"].T + params["b3"].T, 0.0)
    out = h @ params["w4"].T + params["b4"].T
    if apply_softmax:
        out = jax.nn.softmax(out, axis=1)
    return out


if __name__ == "__main__":
    key = jax.random.PRNGKey(0)
    kp, kx1, kx2 = jax.random.split(key, 3)
    params = init_params(kp)

    ok = True
    # (lane-aligned batch with 2 grid steps) and (ragged batch -> padding path)
    for B, kx in ((256, kx1), (50, kx2)):
        x = jax.random.normal(kx, (B, INPUT_DIM), jnp.float32)

        out = jax.block_until_ready(pose_mlp_forward(x, params, apply_softmax=False))
        out_sm = jax.block_until_ready(pose_mlp_forward(x, params, apply_softmax=True))

        # sanity-check against pure-JAX f32 reference (kernel uses bf16 MXU operands
        # with f32 accumulation -> looser tolerance than pure f32)
        ref = reference_forward(x, params, apply_softmax=False)
        ref_sm = reference_forward(x, params, apply_softmax=True)
        ok &= bool(jnp.allclose(out, ref, atol=2e-2, rtol=2e-2))
        ok &= bool(jnp.allclose(out_sm, ref_sm, atol=2e-2, rtol=2e-2))

    assert ok
    print("KERNEL_OK")
</pallas_src>

<mosaic_0001>
module attributes {stable_mosaic.version = 11 : i64} {
  func.func @_mlp_kernel(%arg0: i32, %arg1: memref<1x128xf32, #tpu.memory_space<vmem>>, %arg2: memref<180x1xf32, #tpu.memory_space<vmem>>, %arg3: memref<180x1xf32, #tpu.memory_space<vmem>>, %arg4: memref<300x180xbf16, #tpu.memory_space<vmem>>, %arg5: memref<300x1xf32, #tpu.memory_space<vmem>>, %arg6: memref<120x300xbf16, #tpu.memory_space<vmem>>, %arg7: memref<120x1xf32, #tpu.memory_space<vmem>>, %arg8: memref<6x120xbf16, #tpu.memory_space<vmem>>, %arg9: memref<6x1xf32, #tpu.memory_space<vmem>>, %arg10: memref<6x128xf32, #tpu.memory_space<vmem>>) attributes {dimension_semantics = [#tpu.dimension_semantics<parallel>], iteration_bounds = array<i64: 2>, scalar_prefetch = 0 : i64, scratch_operands = 0 : i64, tpu.core_type = #tpu.core_type<tc>, window_params = [{transform_indices = @transform_0, window_bounds = array<i64: 1, 128>}, {pipeline_mode = #tpu.pipeline_mode<synchronous>, transform_indices = @transform_1, window_bounds = array<i64: 180, 1>}, {pipeline_mode = #tpu.pipeline_mode<synchronous>, transform_indices = @transform_2, window_bounds = array<i64: 180, 1>}, {pipeline_mode = #tpu.pipeline_mode<synchronous>, transform_indices = @transform_3, window_bounds = array<i64: 300, 180>}, {pipeline_mode = #tpu.pipeline_mode<synchronous>, transform_indices = @transform_4, window_bounds = array<i64: 300, 1>}, {pipeline_mode = #tpu.pipeline_mode<synchronous>, transform_indices = @transform_5, window_bounds = array<i64: 120, 300>}, {pipeline_mode = #tpu.pipeline_mode<synchronous>, transform_indices = @transform_6, window_bounds = array<i64: 120, 1>}, {pipeline_mode = #tpu.pipeline_mode<synchronous>, transform_indices = @transform_7, window_bounds = array<i64: 6, 120>}, {pipeline_mode = #tpu.pipeline_mode<synchronous>, transform_indices = @transform_8, window_bounds = array<i64: 6, 1>}, {transform_indices = @transform_9, window_bounds = array<i64: 6, 128>}]} {
    %c0 = arith.constant 0 : index
    %c0_0 = arith.constant 0 : index
    %0 = vector.load %arg1[%c0, %c0_0] : memref<1x128xf32, #tpu.memory_space<vmem>>, vector<1x128xf32>
    %c0_1 = arith.constant 0 : index
    %c0_2 = arith.constant 0 : index
    %1 = vector.load %arg2[%c0_1, %c0_2] : memref<180x1xf32, #tpu.memory_space<vmem>>, vector<180x1xf32>
    %2 = vector.broadcast %1 : vector<180x1xf32> to vector<180x128xf32>
    %3 = vector.broadcast %0 : vector<1x128xf32> to vector<180x128xf32>
    %4 = arith.mulf %2, %3 : vector<180x128xf32>
    %c0_3 = arith.constant 0 : index
    %c0_4 = arith.constant 0 : index
    %5 = vector.load %arg3[%c0_3, %c0_4] : memref<180x1xf32, #tpu.memory_space<vmem>>, vector<180x1xf32>
    %6 = vector.broadcast %5 : vector<180x1xf32> to vector<180x128xf32>
    %7 = arith.addf %4, %6 : vector<180x128xf32>
    %cst = arith.constant 0.000000e+00 : f32
    %8 = vector.broadcast %cst : f32 to vector<180x128xf32>
    %9 = arith.maximumf %7, %8 : vector<180x128xf32>
    %c0_5 = arith.constant 0 : index
    %c0_6 = arith.constant 0 : index
    %10 = vector.load %arg4[%c0_5, %c0_6] : memref<300x180xbf16, #tpu.memory_space<vmem>>, vector<300x180xbf16>
    %11 = arith.truncf %9 : vector<180x128xf32> to vector<180x128xbf16>
    %cst_7 = arith.constant dense<0.000000e+00> : vector<300x128xf32>
    %12 = tpu.matmul %10, %11, %cst_7 {dimension_numbers = #tpu.dot_dimension_numbers<[1], [0], [0], [1], [0, 0, 1, 1], [], []>} : vector<300x180xbf16>, vector<180x128xbf16>, vector<300x128xf32> -> vector<300x128xf32>
    %c0_8 = arith.constant 0 : index
    %c0_9 = arith.constant 0 : index
    %13 = vector.load %arg5[%c0_8, %c0_9] : memref<300x1xf32, #tpu.memory_space<vmem>>, vector<300x1xf32>
    %14 = vector.broadcast %13 : vector<300x1xf32> to vector<300x128xf32>
    %15 = arith.addf %12, %14 : vector<300x128xf32>
    %cst_10 = arith.constant 0.000000e+00 : f32
    %16 = vector.broadcast %cst_10 : f32 to vector<300x128xf32>
    %17 = arith.maximumf %15, %16 : vector<300x128xf32>
    %c0_11 = arith.constant 0 : index
    %c0_12 = arith.constant 0 : index
    %18 = vector.load %arg6[%c0_11, %c0_12] : memref<120x300xbf16, #tpu.memory_space<vmem>>, vector<120x300xbf16>
    %19 = arith.truncf %17 : vector<300x128xf32> to vector<300x128xbf16>
    %cst_13 = arith.constant dense<0.000000e+00> : vector<120x128xf32>
    %20 = tpu.matmul %18, %19, %cst_13 {dimension_numbers = #tpu.dot_dimension_numbers<[1], [0], [0], [1], [0, 0, 1, 1], [], []>} : vector<120x300xbf16>, vector<300x128xbf16>, vector<120x128xf32> -> vector<120x128xf32>
    %c0_14 = arith.constant 0 : index
    %c0_15 = arith.constant 0 : index
    %21 = vector.load %arg7[%c0_14, %c0_15] : memref<120x1xf32, #tpu.memory_space<vmem>>, vector<120x1xf32>
    %22 = vector.broadcast %21 : vector<120x1xf32> to vector<120x128xf32>
    %23 = arith.addf %20, %22 : vector<120x128xf32>
    %cst_16 = arith.constant 0.000000e+00 : f32
    %24 = vector.broadcast %cst_16 : f32 to vector<120x128xf32>
    %25 = arith.maximumf %23, %24 : vector<120x128xf32>
    %c0_17 = arith.constant 0 : index
    %c0_18 = arith.constant 0 : index
    %26 = vector.load %arg8[%c0_17, %c0_18] : memref<6x120xbf16, #tpu.memory_space<vmem>>, vector<6x120xbf16>
    %27 = arith.truncf %25 : vector<120x128xf32> to vector<120x128xbf16>
    %cst_19 = arith.constant dense<0.000000e+00> : vector<6x128xf32>
    %28 = tpu.matmul %26, %27, %cst_19 {dimension_numbers = #tpu.dot_dimension_numbers<[1], [0], [0], [1], [0, 0, 1, 1], [], []>} : vector<6x120xbf16>, vector<120x128xbf16>, vector<6x128xf32> -> vector<6x128xf32>
    %c0_20 = arith.constant 0 : index
    %c0_21 = arith.constant 0 : index
    %29 = vector.load %arg9[%c0_20, %c0_21] : memref<6x1xf32, #tpu.memory_space<vmem>>, vector<6x1xf32>
    %30 = vector.broadcast %29 : vector<6x1xf32> to vector<6x128xf32>
    %31 = arith.addf %28, %30 : vector<6x128xf32>
    %c0_22 = arith.constant 0 : index
    %c0_23 = arith.constant 0 : index
    %32 = vector.load %arg10[%c0_22, %c0_23] : memref<6x128xf32, #tpu.memory_space<vmem>>, vector<6x128xf32>
    tpu.vector_store %arg10[%c0_22, %c0_23], %31 {strides = array<i32>} : memref<6x128xf32, #tpu.memory_space<vmem>>, vector<6x128xf32>,
    return
  }
  func.func @transform_0(%arg0: i32) -> (i32, i32) {
    %c0_i32 = arith.constant 0 : i32
    %c0_i32_0 = arith.constant 0 : i32
    return %c0_i32, %arg0 : i32, i32
  }
  func.func @transform_1(%arg0: i32) -> (i32, i32) {
    %c0_i32 = arith.constant 0 : i32
    %c0_i32_0 = arith.constant 0 : i32
    %c0_i32_1 = arith.constant 0 : i32
    return %c0_i32, %c0_i32_0 : i32, i32
  }
  func.func @transform_2(%arg0: i32) -> (i32, i32) {
    %c0_i32 = arith.constant 0 : i32
    %c0_i32_0 = arith.constant 0 : i32
    %c0_i32_1 = arith.constant 0 : i32
    return %c0_i32, %c0_i32_0 : i32, i32
  }
  func.func @transform_3(%arg0: i32) -> (i32, i32) {
    %c0_i32 = arith.constant 0 : i32
    %c0_i32_0 = arith.constant 0 : i32
    %c0_i32_1 = arith.constant 0 : i32
    return %c0_i32, %c0_i32_0 : i32, i32
  }
  func.func @transform_4(%arg0: i32) -> (i32, i32) {
    %c0_i32 = arith.constant 0 : i32
    %c0_i32_0 = arith.constant 0 : i32
    %c0_i32_1 = arith.constant 0 : i32
    return %c0_i32, %c0_i32_0 : i32, i32
  }
  func.func @transform_5(%arg0: i32) -> (i32, i32) {
    %c0_i32 = arith.constant 0 : i32
    %c0_i32_0 = arith.constant 0 : i32
    %c0_i32_1 = arith.constant 0 : i32
    return %c0_i32, %c0_i32_0 : i32, i32
  }
  func.func @transform_6(%arg0: i32) -> (i32, i32) {
    %c0_i32 = arith.constant 0 : i32
    %c0_i32_0 = arith.constant 0 : i32
    %c0_i32_1 = arith.constant 0 : i32
    return %c0_i32, %c0_i32_0 : i32, i32
  }
  func.func @transform_7(%arg0: i32) -> (i32, i32) {
    %c0_i32 = arith.constant 0 : i32
    %c0_i32_0 = arith.constant 0 : i32
    %c0_i32_1 = arith.constant 0 : i32
    return %c0_i32, %c0_i32_0 : i32, i32
  }
  func.func @transform_8(%arg0: i32) -> (i32, i32) {
    %c0_i32 = arith.constant 0 : i32
    %c0_i32_0 = arith.constant 0 : i32
    %c0_i32_1 = arith.constant 0 : i32
    return %c0_i32, %c0_i32_0 : i32, i32
  }
  func.func @transform_9(%arg0: i32) -> (i32, i32) {
    %c0_i32 = arith.constant 0 : i32
    %c0_i32_0 = arith.constant 0 : i32
    return %c0_i32, %arg0 : i32, i32
  }
}

</mosaic_0001>

<bundles_post_ra>
// kernel: tpu_custom_call.1
= control target key start
LH: loop header
LB: loop body
LE: loop exit
PB: predicated region body
PF: predicated region fallthrough
CT: control target
= control target key end

     0   :  { %14 = vsyncpa [#allocation3], 0  ;;  %s3315_s0 = inlined_call_operand.vmem [shape: f32[1,256], index: 0, kind: input, shape index: {}]   ;;  %s3316_s1 = inlined_call_operand.vmem [shape: f32[180,1], index: 1, kind: input, shape index: {}]   ;;  %s3317_s2 = inlined_call_operand.vmem [shape: f32[180,1], index: 2, kind: input, shape index: {}]   ;;  %s3318_s3 = inlined_call_operand.vmem [shape: bf16[300,180], index: 3, kind: input, shape index: {}]   ;;  %s3319_s4 = inlined_call_operand.vmem [shape: f32[300,1], index: 4, kind: input, shape index: {}]   ;;  %s3320_s5 = inlined_call_operand.vmem [shape: bf16[120,300], index: 5, kind: input, shape index: {}]   ;;  %s3321_s6 = inlined_call_operand.vmem [shape: f32[120,1], index: 6, kind: input, shape index: {}]   ;;  %s3322_s7 = inlined_call_operand.vmem [shape: bf16[6,120], index: 7, kind: input, shape index: {}]   ;;  %s3323_s8 = inlined_call_operand.vmem [shape: f32[6,1], index: 8, kind: input, shape index: {}]   ;;  %s3324_s9 = inlined_call_operand.hbm [shape: f32[6,256], index: 9, kind: output, shape index: {}]  }
   0x1   :  { %16 = vsyncpa [#allocation3 + $0x1], 0  ;;  %s2511_s30 = smov 0   ;;  %s2513_s10 = smov 0  }
   0x2   :  { %s2515_s11 = smov 0   ;;  %s2517_s12 = smov 0  }
   0x3 LB: > { %s2532_s13 = sadd.s32 4294967295, %s2455_s12   ;;  %s2036_s14 = sadd.s32 4294967294, %s2455_s12   ;;  %s2455_s12 = sphi %s2517_s12, %s3330_s12   ;;  %s2451_s11 = sphi %s2515_s11, %s3329_s11   ;;  %s2447_s10 = sphi %s2513_s10, %s3328_s10   ;;  %s2443_s30 = sphi %s2511_s30, %s3327_s30  }
   0x4   : > { %s2536_s15 = sadd.s32 1, %s2455_s12   ;;  %s223_s16 = sadd.s32 1, %s2451_s11 }
   0x5   : > { %s220_s17 = ssub.s32 %s2455_s12, %s2536_s15  ;;  %p233_p0 = scmp.ne.s32.totalorder %s2451_s11, %s2447_s10 }
   0x6   : > { %p221_p1 = scmp.eq.s32.totalorder %s220_s17, 0  ;;  %p234_p2 = scmp.eq.s32.totalorder %s2532_s13, 1 }
   0x7   : > { %p239_p3 = scmp.ne.s32.totalorder %s2447_s10, %s2443_s30  ;;  %p240_p4 = scmp.eq.s32.totalorder %s2036_s14, 1 }
   0x8   : > { %s2547_s18 = scalar_select %p221_p1, %s2451_s11, %s223_s16  }
   0x9   : > { %p2549_p5 = por %p234_p2, %p233_p0  ;;  %p2553_p6 = por %p240_p4, %p239_p3 }
   0xa   : > { %p2039_p7 = scmp.ge.s32.totalorder %s2455_s12, 1  ;;  %p288_p8 = scmp.lt.s32.totalorder %s2455_s12, 3 }
   0xc   : > { %p289_p9 = pnand %p2039_p7, %p288_p8 }
   0xd   : > { %p322_p10 = scmp.lt.s32.totalorder (!%p289_p9), %s2532_s13, 1  ;;  %s319_s25 = sand.u32 (!%p289_p9), 1, %s2447_s10  }
   0xe   : > { %292 = sbr.rel (%p289_p9) target bundleno = 1126 (0x466), region = 56  ;;  %s2040_s26 = sshll.u32 (!%p289_p9), %s319_s25, 3 }
   0xf   : > { %s2133_s27 = sshll.u32 (!%p289_p9), %s2532_s13, 7  ;;  %s321_s28 = scalar_lea.vmem (!%p289_p9), [#allocation2], %s2040_s26 }
  0x10   : > { %s1980_s29 = sshll.u32 (!%p289_p9), %s321_s28, 4  ;;  %s3274_s17 = scalar_lea.hbm (!%p289_p9), %s3324_s9, %s2133_s27  ;;  %s3276_s29 = int_to_ptr.vmem [resolvable:$true] %s1980_s29 }
  0x11   : > { %s1967_s21 = scalar_lea.sflag (!%p289_p9), [#allocation3], %s319_s25  ;;  %s2460_s22 = smov (!%p289_p9), [#allocation2]  }
  0x12   : > { %s2399_s24 = sshll.u32 (!%p289_p9), %s2460_s22, 4  ;;  %s2400_s24 = int_to_ptr.vmem [resolvable:$false] %s2399_s24 }
  0x13   : > { %v508_v0 = vld [vmem:[%s3317_s2 + $0x70] sm:$0xff]  ;;  %v2457_v2 = vmov 0   ;;  %v509_v3 = vld [vmem:[%s3317_s2 + $0x78] sm:$0xff]  ;;  %v340_v5 = vld [vmem:[%s3316_s1 + $0x68] sm:$0xff]  ;;  %vm1127_vm0 = vcmask 424960   ;;  %s323_s23 = scalar_select %p322_p10, %s2532_s13, 1 }
  0x14   : > { %v341_v1 = vld [vmem:[%s3316_s1 + $0x70] sm:$0xff]  ;;  %2306 = vset.pattern.permute.xlu1 %v2457_v2  ;;  %2305 = vset.pattern.permute.xlu0 %v2457_v2  ;;  %v342_v4 = vld [vmem:[%s3316_s1 + $0x78] sm:$0xff]  ;;  %v339_v6 = vld [vmem:[%s3316_s1 + $0x60] sm:$0xff]  ;;  %vm1185_vm1 = vcmask 1041408   ;;  %vm1691_vm2 = vcmask 1045504   ;;  %vm1666_vm3 = vcmask 359424   ;;  %p2402_p0 = scmp.lt.s32.totalorder %s3276_s29, %s2400_s24 }
  0x15   : > { %589 = vperm.xlu1 %2306, %v508_v0   ;;  %422 = vperm.xlu0 %2305, %v341_v1   ;;  %v507_v7 = vld [vmem:[%s3317_s2 + $0x68] sm:$0xff]  ;;  %v506_v8 = vld [vmem:[%s3317_s2 + $0x60] sm:$0xff]  ;;  %v338_v9 = vld [vmem:[%s3316_s1 + $0x58] sm:$0xff]  ;;  %s324_s14 = scalar_lea.vmem %s3315_s0, %s323_s23  ;;  %vm2459_vm4 = vmmov 0   ;;  %vm1921_vm5 = vcmask 1043456   ;;  %vm1917_vm6 = vcmask 982016  }
  0x16   : > { %1189 = vmatprep.subr.bf16.mxu0 %v2457_v2  ;;  %v337_v10 = vld [vmem:[%s3316_s1 + $0x50] sm:$0xff]  ;;  %v505_v11 = vld [vmem:[%s3317_s2 + $0x58] sm:$0xff]  ;;  %v336_v13 = vld [vmem:[%s3316_s1 + $0x48] sm:$0xff]  ;;  %s2395_s13 = scalar_lea.vmem %s3276_s29, 128  ;;  %s2401_s23 = scalar_lea.vmem %s2400_s24, 256 }
  0x17   : > { %v504_v12 = vld [vmem:[%s3317_s2 + $0x50] sm:$0xff]  ;;  %v335_v14 = vld [vmem:[%s3316_s1 + $0x40] sm:$0xff]  ;;  %v503_v15 = vld [vmem:[%s3317_s2 + $0x48] sm:$0xff]  ;;  %p2396_p11 = scmp.ne.s32.totalorder %s3276_s29, %s2395_s13  ;;  %p2403_p1 = scmp.lt.s32.totalorder %s2401_s23, %s2395_s13 }
  0x18   : > { %v502_v16 = vld [vmem:[%s3317_s2 + $0x40] sm:$0xff]  ;;  %v334_v17 = vld [vmem:[%s3316_s1 + $0x38] sm:$0xff]  ;;  %v333_v18 = vld [vmem:[%s3316_s1 + $0x30] sm:$0xff] }
  0x19   : > { %594 = vperm.xlu1 %2306, %v509_v3   ;;  %427 = vperm.xlu0 %2305, %v342_v4   ;;  %v501_v19 = vld [vmem:[%s3317_s2 + $0x38] sm:$0xff]  ;;  %v500_v20 = vld [vmem:[%s3317_s2 + $0x30] sm:$0xff]  ;;  %v332_v21 = vld [vmem:[%s3316_s1 + $0x28] sm:$0xff]  ;;  %p2397_p12 = pnand %p2396_p11, %p2549_p5  ;;  %p2404_p2 = por %p2403_p1, %p2402_p0 }
  0x1a   : > { %v331_v22 = vld [vmem:[%s3316_s1 + $0x20] sm:$0xff]  ;;  %v499_v23 = vld [vmem:[%s3317_s2 + $0x28] sm:$0xff]  ;;  %v330_v25 = vld [vmem:[%s3316_s1 + $0x18] sm:$0xff] }
  0x1b   : > { %v498_v24 = vld [vmem:[%s3317_s2 + $0x20] sm:$0xff]  ;;  %v329_v26 = vld [vmem:[%s3316_s1 + $0x10] sm:$0xff]  ;;  %v497_v27 = vld [vmem:[%s3317_s2 + $0x18] sm:$0xff]  ;;  %p2398_p13 = pneg %p2397_p12 }
  0x1c   : > { %v496_v28 = vld [vmem:[%s3317_s2 + $0x10] sm:$0xff]  ;;  %v328_v29 = vld [vmem:[%s3316_s1 + $0x8] sm:$0xff]  ;;  %v327_v30 = vld [vmem:[%s3316_s1] sm:$0xff] }
  0x1d   : > { %417 = vperm.xlu1 %2306, %v340_v5   ;;  %412 = vperm.xlu0 %2305, %v339_v6   ;;  %v495_v31 = vld [vmem:[%s3317_s2 + $0x8] sm:$0xff]  ;;  %v494_v32 = vld [vmem:[%s3317_s2] sm:$0xff]  ;;  %v516_v33 = vld [vmem:[%s3317_s2 + $0xb0] sm:$0xf]  ;;  %p2405_p3 = pnand %p2404_p2, %p2398_p13 }
  0x1e   : > { %v349_v34 = vld [vmem:[%s3316_s1 + $0xb0] sm:$0xf]  ;;  %v348_v35 = vld [vmem:[%s3316_s1 + $0xa8] sm:$0xff]  ;;  %v347_v36 = vld [vmem:[%s3316_s1 + $0xa0] sm:$0xff] }
  0x1f   : > { %v515_v37 = vld [vmem:[%s3317_s2 + $0xa8] sm:$0xff]  ;;  %v514_v38 = vld [vmem:[%s3317_s2 + $0xa0] sm:$0xff]  ;;  %v346_v39 = vld [vmem:[%s3316_s1 + $0x98] sm:$0xff] }
  0x20   : > { %v345_v40 = vld [vmem:[%s3316_s1 + $0x90] sm:$0xff]  ;;  %v513_v41 = vld [vmem:[%s3317_s2 + $0x98] sm:$0xff]  ;;  %v344_v43 = vld [vmem:[%s3316_s1 + $0x88] sm:$0xff] }
  0x21   : > { %584 = vperm.xlu1 %2306, %v507_v7   ;;  %579 = vperm.xlu0 %2305, %v506_v8   ;;  %v512_v42 = vld [vmem:[%s3317_s2 + $0x90] sm:$0xff]  ;;  %v343_v44 = vld [vmem:[%s3316_s1 + $0x80] sm:$0xff]  ;;  %v511_v45 = vld [vmem:[%s3317_s2 + $0x88] sm:$0xff] }
  0x22   : > { %v510_v46 = vld [vmem:[%s3317_s2 + $0x80] sm:$0xff]  ;;  %v759_v47 = vld [vmem:[%s3319_s4 + $0xf8] sm:$0xff]  ;;  %v758_v48 = vld [vmem:[%s3319_s4 + $0xf0] sm:$0xff] }
  0x23   : > { %v2309_v49 = vld [vmem:[%s3318_s3 + $0x4] ss:$8 sps:$4 sm:$0xff]   ;;  %v743_v50 = vld [vmem:[%s3319_s4 + $0x78] sm:$0xff]  ;;  %v742_v51 = vld [vmem:[%s3319_s4 + $0x70] sm:$0xff] }
  0x24   : > { %2080 = vmatprep.mubr.msk.bf16.mxu0 %vm1127_vm0, %v2309_v49  ;;  %v757_v52 = vld [vmem:[%s3319_s4 + $0xe8] sm:$0xff]  ;;  %v756_v53 = vld [vmem:[%s3319_s4 + $0xe0] sm:$0xff]  ;;  %v755_v56 = vld [vmem:[%s3319_s4 + $0xd8] sm:$0xff] }
  0x25   : > { %407 = vperm.xlu1 %2306, %v338_v9   ;;  %402 = vperm.xlu0 %2305, %v337_v10   ;;  %v741_v54 = vld [vmem:[%s3319_s4 + $0x68] sm:$0xff]  ;;  %v740_v55 = vld [vmem:[%s3319_s4 + $0x60] sm:$0xff]  ;;  %v754_v57 = vld [vmem:[%s3319_s4 + $0xd0] sm:$0xff] }
  0x26   : > { %v739_v58 = vld [vmem:[%s3319_s4 + $0x58] sm:$0xff]  ;;  %v738_v59 = vld [vmem:[%s3319_s4 + $0x50] sm:$0xff]  ;;  %v753_v60 = vld [vmem:[%s3319_s4 + $0xc8] sm:$0xff] }
  0x27   : > { %v752_v61 = vld [vmem:[%s3319_s4 + $0xc0] sm:$0xff]  ;;  %v737_v62 = vld [vmem:[%s3319_s4 + $0x48] sm:$0xff]  ;;  %v751_v1 = vld [vmem:[%s3319_s4 + $0xb8] sm:$0xff] }
  0x28   : > { %v736_v63 = vld [vmem:[%s3319_s4 + $0x40] sm:$0xff]  ;;  %v750_v3 = vld [vmem:[%s3319_s4 + $0xb0] sm:$0xff]  ;;  %v735_v7 = vld [vmem:[%s3319_s4 + $0x38] sm:$0xff] }
  0x29   : > { %574 = vperm.xlu1 %2306, %v505_v11   ;;  %569 = vperm.xlu0 %2305, %v504_v12   ;;  %v2757_v0 = vld [vmem:[%s324_s14] ss:$0 sm:$0xff]  ;;  %v734_v8 = vld [vmem:[%s3319_s4 + $0x30] sm:$0xff] }
  0x2d   : > { %397 = vperm.xlu1 %2306, %v336_v13   ;;  %392 = vperm.xlu0 %2305, %v335_v14   ;;  %v749_v13 = vld [vmem:[%s3319_s4 + $0xa8] sm:$0xff]  ;;  %v748_v14 = vld [vmem:[%s3319_s4 + $0xa0] sm:$0xff] }
  0x31   : > { %564 = vperm.xlu1 %2306, %v503_v15   ;;  %559 = vperm.xlu0 %2305, %v502_v16  }
  0x35   : > { %387 = vperm.xlu1 %2306, %v334_v17   ;;  %382 = vperm.xlu0 %2305, %v333_v18  }
  0x39   : > { %554 = vperm.xlu1 %2306, %v501_v19   ;;  %549 = vperm.xlu0 %2305, %v500_v20   ;;  %v733_v20 = vld [vmem:[%s3319_s4 + $0x28] sm:$0xff] }
  0x3d   : > { %377 = vperm.xlu1 %2306, %v332_v21   ;;  %372 = vperm.xlu0 %2305, %v331_v22   ;;  %v732_v21 = vld [vmem:[%s3319_s4 + $0x20] sm:$0xff] }
  0x41   : > { %544 = vperm.xlu1 %2306, %v499_v23   ;;  %539 = vperm.xlu0 %2305, %v498_v24  }
  0x45   : > { %367 = vperm.xlu1 %2306, %v330_v25   ;;  %362 = vperm.xlu0 %2305, %v329_v26  }
  0x49   : > { %534 = vperm.xlu1 %2306, %v497_v27   ;;  %529 = vperm.xlu0 %2305, %v496_v28  }
  0x4d   : > { %357 = vperm.xlu1 %2306, %v328_v29   ;;  %352 = vperm.xlu0 %2305, %v327_v30   ;;  %v747_v29 = vld [vmem:[%s3319_s4 + $0x98] sm:$0xff]  ;;  %v746_v30 = vld [vmem:[%s3319_s4 + $0x90] sm:$0xff] }
  0x51   : > { %524 = vperm.xlu1 %2306, %v495_v31   ;;  %519 = vperm.xlu0 %2305, %v494_v32  }
  0x55   : > { %629 = vperm.xlu1 %2306, %v516_v33   ;;  %462 = vperm.xlu0 %2305, %v349_v34  }
  0x59   : > { %457 = vperm.xlu1 %2306, %v348_v35   ;;  %452 = vperm.xlu0 %2305, %v347_v36   ;;  %v731_v36 = vld [vmem:[%s3319_s4 + $0x18] sm:$0xff] }
  0x5d   : > { %624 = vperm.xlu1 %2306, %v515_v37   ;;  %619 = vperm.xlu0 %2305, %v514_v38   ;;  %v730_v37 = vld [vmem:[%s3319_s4 + $0x10] sm:$0xff] }
  0x61   : > { %447 = vperm.xlu1 %2306, %v346_v39   ;;  %442 = vperm.xlu0 %2305, %v345_v40  }
  0x65   : > { %614 = vperm.xlu1 %2306, %v513_v41   ;;  %609 = vperm.xlu0 %2305, %v512_v42  }
  0x69   : > { %437 = vperm.xlu1 %2306, %v344_v43   ;;  %432 = vperm.xlu0 %2305, %v343_v44   ;;  %v745_v44 = vld [vmem:[%s3319_s4 + $0x88] sm:$0xff] }
  0x6d   : > { %604 = vperm.xlu1 %2306, %v511_v45   ;;  %599 = vperm.xlu0 %2305, %v510_v46   ;;  %v744_v45 = vld [vmem:[%s3319_s4 + $0x80] sm:$0xff] }
  0x71   : > { %923 = vperm.xlu1 %2306, %v759_v47   ;;  %918 = vperm.xlu0 %2305, %v758_v48  }
  0x75   : > { %843 = vperm.xlu1 %2306, %v743_v50   ;;  %838 = vperm.xlu0 %2305, %v742_v51   ;;  %v729_v51 = vld [vmem:[%s3319_s4 + $0x8] sm:$0xff] }
  0x79   : > { %913 = vperm.xlu1 %2306, %v757_v52   ;;  %908 = vperm.xlu0 %2305, %v756_v53   ;;  %v728_v52 = vld [vmem:[%s3319_s4] sm:$0xff] }
  0x7d   : > { %833 = vperm.xlu1 %2306, %v741_v54   ;;  %828 = vperm.xlu0 %2305, %v740_v55  }
  0x81   : > { %903 = vperm.xlu1 %2306, %v755_v56   ;;  %898 = vperm.xlu0 %2305, %v754_v57  }
  0x85   : > { %823 = vperm.xlu1 %2306, %v739_v58   ;;  %818 = vperm.xlu0 %2305, %v738_v59   ;;  %v765_v59 = vld [vmem:[%s3319_s4 + $0x128] sm:$0xf] }
  0x89   : > { %893 = vperm.xlu1 %2306, %v753_v60   ;;  %888 = vperm.xlu0 %2305, %v752_v61   ;;  %v764_v60 = vld [vmem:[%s3319_s4 + $0x120] sm:$0xff] }
  0x8d   : > { %813 = vperm.xlu1 %2306, %v737_v62   ;;  %808 = vperm.xlu0 %2305, %v736_v63  }
  0x90   : > { %v590_v4 = vpop.permute.xlu1 %589  ;;  %v423_v5 = vpop.permute.xlu0 %422 }
  0x91   : > { %v485_v6 = vmul.f32 %v2757_v0, %v423_v5  ;;  %883 = vperm.xlu1 %2306, %v751_v1   ;;  %878 = vperm.xlu0 %2305, %v750_v3   ;;  %v762_v5 = vld [vmem:[%s3319_s4 + $0x110] sm:$0xff] }
  0x93   : > { %v646_v11 = vadd.f32 %v590_v4, %v485_v6  ;;  %v763_v4 = vld [vmem:[%s3319_s4 + $0x118] sm:$0xff] }
  0x94   : > { %v595_v9 = vpop.permute.xlu1 %594  ;;  %v428_v10 = vpop.permute.xlu0 %427 }
  0x95   : > { %v486_v12 = vmul.f32 %v2757_v0, %v428_v10  ;;  %803 = vperm.xlu1 %2306, %v735_v7   ;;  %798 = vperm.xlu0 %2305, %v734_v8   ;;  %v669_v19 = vmax.f32 %v646_v11, 0.0 }
  0x97   : > { %v647_v15 = vadd.f32 %v595_v9, %v486_v12  ;;  %v761_v12 = vld [vmem:[%s3319_s4 + $0x108] sm:$0xff] }
  0x98   : > { %v418_v16 = vpop.permute.xlu1 %417  ;;  %v413_v17 = vpop.permute.xlu0 %412 }
  0x99   : > { %v670_v18 = vmax.f32 %v647_v15, 0.0  ;;  %873 = vperm.xlu1 %2306, %v749_v13   ;;  %868 = vperm.xlu0 %2305, %v748_v14   ;;  %v484_v22 = vmul.f32 %v2757_v0, %v418_v16  ;;  %v483_v23 = vmul.f32 %v2757_v0, %v413_v17  ;;  %v760_v13 = vld [vmem:[%s3319_s4 + $0x100] sm:$0xff] }
  0x9b   : > { %v723_v24 = vpack.c.bf16 %v670_v18, %v669_v19  ;;  %v1473_v19 = vld [vmem:[%s3321_s6 + $0x60] sm:$0xff] }
  0x9c   : > { %v585_v25 = vpop.permute.xlu1 %584  ;;  %v580_v26 = vpop.permute.xlu0 %579 }
  0x9d   : > { %v645_v27 = vadd.f32 %v585_v25, %v484_v22  ;;  %v644_v28 = vadd.f32 %v580_v26, %v483_v23  ;;  %793 = vperm.xlu1 %2306, %v733_v20   ;;  %788 = vperm.xlu0 %2305, %v732_v21   ;;  %v1475_v20 = vld [vmem:[%s3321_s6 + $0x70] sm:$0xff] }
  0x9e   : > { %1190 = vmatpush1.bf16.msra.mxu0 %v723_v24 }
  0x9f   : > { %v668_v31 = vmax.f32 %v645_v27, 0.0  ;;  %v667_v32 = vmax.f32 %v644_v28, 0.0  ;;  %1191 = vmatprep.subr.bf16.mxu0 %v2457_v2  ;;  %v1471_v27 = vld [vmem:[%s3321_s6 + $0x50] sm:$0xff]  ;;  %v1474_v28 = vld [vmem:[%s3321_s6 + $0x68] sm:$0xff] }
  0xa0   : > { %v408_v33 = vpop.permute.xlu1 %407  ;;  %v403_v34 = vpop.permute.xlu0 %402 }
  0xa1   : > { %v722_v35 = vpack.c.bf16 %v668_v31, %v667_v32  ;;  %863 = vperm.xlu1 %2306, %v747_v29   ;;  %858 = vperm.xlu0 %2305, %v746_v30   ;;  %v482_v38 = vmul.f32 %v2757_v0, %v408_v33  ;;  %v481_v39 = vmul.f32 %v2757_v0, %v403_v34  ;;  %v1469_v34 = vld [vmem:[%s3321_s6 + $0x40] sm:$0xff] }
  0xa3   : > { %1192 = vmatpush1.bf16.msra.mxu0 %v722_v35  ;;  %v1472_v35 = vld [vmem:[%s3321_s6 + $0x58] sm:$0xff] }
  0xa4   : > { %v575_v40 = vpop.permute.xlu1 %574  ;;  %v570_v41 = vpop.permute.xlu0 %569  ;;  %1193 = vmatprep.subr.bf16.mxu0 %v2457_v2 }
  0xa5   : > { %v643_v42 = vadd.f32 %v575_v40, %v482_v38  ;;  %v642_v43 = vadd.f32 %v570_v41, %v481_v39  ;;  %783 = vperm.xlu1 %2306, %v731_v36   ;;  %778 = vperm.xlu0 %2305, %v730_v37  }
  0xa7   : > { %v666_v46 = vmax.f32 %v643_v42, 0.0  ;;  %v665_v47 = vmax.f32 %v642_v43, 0.0  ;;  %v1467_v42 = vld [vmem:[%s3321_s6 + $0x30] sm:$0xff]  ;;  %v1470_v43 = vld [vmem:[%s3321_s6 + $0x48] sm:$0xff] }
  0xa8   : > { %v398_v48 = vpop.permute.xlu1 %397  ;;  %v393_v49 = vpop.permute.xlu0 %392 }
  0xa9   : > { %v721_v50 = vpack.c.bf16 %v666_v46, %v665_v47  ;;  %853 = vperm.xlu1 %2306, %v745_v44   ;;  %848 = vperm.xlu0 %2305, %v744_v45   ;;  %v480_v53 = vmul.f32 %v2757_v0, %v398_v48  ;;  %v479_v54 = vmul.f32 %v2757_v0, %v393_v49  ;;  %v1465_v49 = vld [vmem:[%s3321_s6 + $0x20] sm:$0xff] }
  0xab   : > { %1194 = vmatpush1.bf16.msra.mxu0 %v721_v50  ;;  %v1468_v50 = vld [vmem:[%s3321_s6 + $0x38] sm:$0xff] }
  0xac   : > { %v565_v55 = vpop.permute.xlu1 %564  ;;  %v560_v56 = vpop.permute.xlu0 %559  ;;  %1195 = vmatprep.subr.bf16.mxu0 %v2457_v2 }
  0xad   : > { %v641_v57 = vadd.f32 %v565_v55, %v480_v53  ;;  %v640_v58 = vadd.f32 %v560_v56, %v479_v54  ;;  %773 = vperm.xlu1 %2306, %v729_v51   ;;  %768 = vperm.xlu0 %2305, %v728_v52  }
  0xaf   : > { %v664_v61 = vmax.f32 %v641_v57, 0.0  ;;  %v663_v62 = vmax.f32 %v640_v58, 0.0  ;;  %v1463_v57 = vld [vmem:[%s3321_s6 + $0x10] sm:$0xff]  ;;  %v1466_v58 = vld [vmem:[%s3321_s6 + $0x28] sm:$0xff] }
  0xb0   : > { %v388_v63 = vpop.permute.xlu1 %387  ;;  %v383_v1 = vpop.permute.xlu0 %382 }
  0xb1   : > { %v720_v3 = vpack.c.bf16 %v664_v61, %v663_v62  ;;  %953 = vperm.xlu1 %2306, %v765_v59   ;;  %948 = vperm.xlu0 %2305, %v764_v60   ;;  %v478_v6 = vmul.f32 %v2757_v0, %v388_v63  ;;  %v477_v7 = vmul.f32 %v2757_v0, %v383_v1 }
  0xb3   : > { %1196 = vmatpush1.bf16.msra.mxu0 %v720_v3  ;;  %v1461_v3 = vld [vmem:[%s3321_s6] sm:$0xff] }
  0xb4   : > { %v555_v8 = vpop.permute.xlu1 %554  ;;  %v550_v9 = vpop.permute.xlu0 %549  ;;  %1197 = vmatprep.subr.bf16.mxu0 %v2457_v2 }
  0xb5   : > { %v639_v10 = vadd.f32 %v555_v8, %v478_v6  ;;  %v638_v11 = vadd.f32 %v550_v9, %v477_v7  ;;  %943 = vperm.xlu1 %2306, %v763_v4   ;;  %938 = vperm.xlu0 %2305, %v762_v5   ;;  %v1464_v4 = vld [vmem:[%s3321_s6 + $0x18] sm:$0xff]  ;;  %v1911_v9 = vld [vmem:[%s3323_s8] sm:$0x3f] }
  0xb7   : > { %v662_v14 = vmax.f32 %v639_v10, 0.0  ;;  %v661_v15 = vmax.f32 %v638_v11, 0.0  ;;  %v1462_v10 = vld [vmem:[%s3321_s6 + $0x8] sm:$0xff] }
  0xb8   : > { %v378_v16 = vpop.permute.xlu1 %377  ;;  %v373_v17 = vpop.permute.xlu0 %372 }
  0xb9   : > { %v719_v18 = vpack.c.bf16 %v662_v14, %v661_v15  ;;  %933 = vperm.xlu1 %2306, %v761_v12   ;;  %928 = vperm.xlu0 %2305, %v760_v13   ;;  %v476_v21 = vmul.f32 %v2757_v0, %v378_v16  ;;  %v475_v22 = vmul.f32 %v2757_v0, %v373_v17 }
  0xbb   : > { %1198 = vmatpush1.bf16.msra.mxu0 %v719_v18 }
  0xbc   : > { %v545_v23 = vpop.permute.xlu1 %544  ;;  %v540_v24 = vpop.permute.xlu0 %539  ;;  %1199 = vmatprep.subr.bf16.mxu0 %v2457_v2 }
  0xbd   : > { %v637_v25 = vadd.f32 %v545_v23, %v476_v21  ;;  %v636_v26 = vadd.f32 %v540_v24, %v475_v22  ;;  %1538 = vperm.xlu1 %2306, %v1473_v19   ;;  %1548 = vperm.xlu0 %2305, %v1475_v20  }
  0xbf   : > { %v660_v29 = vmax.f32 %v637_v25, 0.0  ;;  %v659_v30 = vmax.f32 %v636_v26, 0.0 }
  0xc0   : > { %v368_v31 = vpop.permute.xlu1 %367  ;;  %v363_v32 = vpop.permute.xlu0 %362 }
  0xc1   : > { %v718_v33 = vpack.c.bf16 %v660_v29, %v659_v30  ;;  %1528 = vperm.xlu1 %2306, %v1471_v27   ;;  %1543 = vperm.xlu0 %2305, %v1474_v28   ;;  %v474_v36 = vmul.f32 %v2757_v0, %v368_v31  ;;  %v473_v37 = vmul.f32 %v2757_v0, %v363_v32 }
  0xc3   : > { %1200 = vmatpush1.bf16.msra.mxu0 %v718_v33 }
  0xc4   : > { %v535_v38 = vpop.permute.xlu1 %534  ;;  %v530_v39 = vpop.permute.xlu0 %529  ;;  %1201 = vmatprep.subr.bf16.mxu0 %v2457_v2 }
  0xc5   : > { %v635_v40 = vadd.f32 %v535_v38, %v474_v36  ;;  %v634_v41 = vadd.f32 %v530_v39, %v473_v37  ;;  %1518 = vperm.xlu1 %2306, %v1469_v34   ;;  %1533 = vperm.xlu0 %2305, %v1472_v35  }
  0xc7   : > { %v658_v44 = vmax.f32 %v635_v40, 0.0  ;;  %v657_v45 = vmax.f32 %v634_v41, 0.0 }
  0xc8   : > { %v358_v46 = vpop.permute.xlu1 %357  ;;  %v353_v47 = vpop.permute.xlu0 %352 }
  0xc9   : > { %v717_v48 = vpack.c.bf16 %v658_v44, %v657_v45  ;;  %1508 = vperm.xlu1 %2306, %v1467_v42   ;;  %1523 = vperm.xlu0 %2305, %v1470_v43   ;;  %v472_v51 = vmul.f32 %v2757_v0, %v358_v46  ;;  %v471_v52 = vmul.f32 %v2757_v0, %v353_v47  ;;  %v2307_v44 = vld [vmem:[%s3318_s3] ss:$8 sps:$4 sm:$0xff]   ;;  %v2310_v45 = vld [vmem:[%s3318_s3 + $0x14] ss:$8 sps:$4 sm:$0xff]  }
  0xca   : > { %v2315_v46 = vld [vmem:[%s3318_s3 + $0x20] ss:$8 sps:$4 sm:$0xff]   ;;  %v2316_v47 = vld [vmem:[%s3318_s3 + $0x34] ss:$8 sps:$4 sm:$0xff]  }
  0xcb   : > { %1202 = vmatpush1.bf16.msra.mxu0 %v717_v48  ;;  %v2318_v48 = vld [vmem:[%s3318_s3 + $0x30] ss:$8 sps:$4 sm:$0xff]  }
  0xcc   : > { %v525_v53 = vpop.permute.xlu1 %524  ;;  %v520_v54 = vpop.permute.xlu0 %519  ;;  %1203 = vmatprep.subr.bf16.mxu0 %v2457_v2 }
  0xcd   : > { %v633_v55 = vadd.f32 %v525_v53, %v472_v51  ;;  %v632_v56 = vadd.f32 %v520_v54, %v471_v52  ;;  %1498 = vperm.xlu1 %2306, %v1465_v49   ;;  %1513 = vperm.xlu0 %2305, %v1468_v50   ;;  %v2319_v49 = vld [vmem:[%s3318_s3 + $0x44] ss:$8 sps:$4 sm:$0xff]   ;;  %v2321_v50 = vld [vmem:[%s3318_s3 + $0x40] ss:$8 sps:$4 sm:$0xff]   ;;  %v2322_v51 = vld [vmem:[%s3318_s3 + $0x54] ss:$8 sps:$4 sm:$0xff]  }
  0xce   : > { %v2324_v52 = vld [vmem:[%s3318_s3 + $0x50] ss:$8 sps:$4 sm:$0xff]   ;;  %v2325_v53 = vld [vmem:[%s3318_s3 + $0x64] ss:$8 sps:$4 sm:$0xff]   ;;  %v2327_v54 = vld [vmem:[%s3318_s3 + $0x60] ss:$8 sps:$4 sm:$0xff]  }
  0xcf   : > { %v656_v59 = vmax.f32 %v633_v55, 0.0  ;;  %v655_v60 = vmax.f32 %v632_v56, 0.0  ;;  %v2328_v55 = vld [vmem:[%s3318_s3 + $0x74] ss:$8 sps:$4 sm:$0xff]   ;;  %v2330_v56 = vld [vmem:[%s3318_s3 + $0x70] ss:$8 sps:$4 sm:$0xff]  }
  0xd0   : > { %v630_v61 = vpop.permute.xlu1 %629  ;;  %v463_v62 = vpop.permute.xlu0 %462 }
  0xd1   : > { %v716_v63 = vpack.c.bf16 %v656_v59, %v655_v60  ;;  %v493_v1 = vmul.f32 %v2757_v0, %v463_v62  ;;  %1488 = vperm.xlu1 %2306, %v1463_v57   ;;  %1503 = vperm.xlu0 %2305, %v1466_v58   ;;  %v2331_v57 = vld [vmem:[%s3318_s3 + $0x84] ss:$8 sps:$4 sm:$0xff]   ;;  %v2333_v58 = vld [vmem:[%s3318_s3 + $0x80] ss:$8 sps:$4 sm:$0xff]   ;;  %v2334_v59 = vld [vmem:[%s3318_s3 + $0x94] ss:$8 sps:$4 sm:$0xff]  }
  0xd2   : > { %v2336_v60 = vld [vmem:[%s3318_s3 + $0x90] ss:$8 sps:$4 sm:$0xff]   ;;  %v2339_v62 = vld [vmem:[%s3318_s3 + $0xa0] ss:$8 sps:$4 sm:$0xff]  }
  0xd3   : > { %v654_v5 = vadd.f32 %v630_v61, %v493_v1  ;;  %1204 = vmatpush1.bf16.msra.mxu0 %v716_v63  ;;  %v2337_v61 = vld [vmem:[%s3318_s3 + $0xa4] ss:$8 sps:$4 sm:$0xff]   ;;  %v2340_v63 = vld [vmem:[%s3318_s3 + $0xb4] ss:$8 sps:$4 sm:$0xff]   ;;  %v2342_v1 = vld [vmem:[%s3318_s3 + $0xb0] ss:$8 sps:$4 sm:$0xff]  }
  0xd4   : > { %v458_v6 = vpop.permute.xlu1 %457  ;;  %v453_v7 = vpop.permute.xlu0 %452  ;;  %1213 = vmatprep.subr.bf16.mxu0 %v2457_v2 }
  0xd5   : > { %v677_v8 = vmax.f32 %v654_v5, 0.0  ;;  %1478 = vperm.xlu1 %2306, %v1461_v3   ;;  %1493 = vperm.xlu0 %2305, %v1464_v4   ;;  %v492_v12 = vmul.f32 %v2757_v0, %v458_v6  ;;  %v491_v13 = vmul.f32 %v2757_v0, %v453_v7  ;;  %v2343_v3 = vld [vmem:[%s3318_s3 + $0xc4] ss:$8 sps:$4 sm:$0xff]   ;;  %v2345_v4 = vld [vmem:[%s3318_s3 + $0xc0] ss:$8 sps:$4 sm:$0xff]  }
  0xd6   : > { %v2346_v5 = vld [vmem:[%s3318_s3 + $0xd4] ss:$8 sps:$4 sm:$0xff]   ;;  %v2348_v6 = vld [vmem:[%s3318_s3 + $0xd0] ss:$8 sps:$4 sm:$0xff]   ;;  %v2349_v7 = vld [vmem:[%s3318_s3 + $0xe4] ss:$8 sps:$4 sm:$0xff]  }
  0xd7   : > { %v727_v11 = vpack.c.bf16 %v677_v8, %v677_v8 }
  0xd8   : > { %v625_v14 = vpop.permute.xlu1 %624  ;;  %v620_v15 = vpop.permute.xlu0 %619 }
  0xd9   : > { %v653_v16 = vadd.f32 %v625_v14, %v492_v12  ;;  %v652_v17 = vadd.f32 %v620_v15, %v491_v13  ;;  %1914 = vperm.xlu1 %2306, %v1911_v9   ;;  %1483 = vperm.xlu0 %2305, %v1462_v10   ;;  %v1187_v18 = vsel %vm1185_vm1, %v727_v11, 0  ;;  %v2351_v10 = vld [vmem:[%s3318_s3 + $0xe0] ss:$8 sps:$4 sm:$0xff]   ;;  %v2352_v11 = vld [vmem:[%s3318_s3 + $0xf4] ss:$8 sps:$4 sm:$0xff]  }
  0xda   : > { %1214 = vmatpush2.bf16.msra.mxu0 %v1187_v18  ;;  %v2354_v15 = vld [vmem:[%s3318_s3 + $0xf0] ss:$8 sps:$4 sm:$0xff]  }
  0xdb   : > { %v676_v19 = vmax.f32 %v653_v16, 0.0  ;;  %v675_v20 = vmax.f32 %v652_v17, 0.0  ;;  %1215 = vmatprep.subr.bf16.mxu0 %v2457_v2  ;;  %v2355_v16 = vld [vmem:[%s3318_s3 + $0x104] ss:$8 sps:$4 sm:$0xff]  }
  0xdc   : > { %v448_v21 = vpop.permute.xlu1 %447  ;;  %v443_v22 = vpop.permute.xlu0 %442 }
  0xdd   : > { %v726_v23 = vpack.c.bf16 %v676_v19, %v675_v20  ;;  %v490_v24 = vmul.f32 %v2757_v0, %v448_v21  ;;  %v489_v25 = vmul.f32 %v2757_v0, %v443_v22  ;;  %v2357_v20 = vld [vmem:[%s3318_s3 + $0x100] ss:$8 sps:$4 sm:$0xff]   ;;  %v2358_v21 = vld [vmem:[%s3318_s3 + $0x114] ss:$8 sps:$4 sm:$0xff]  }
  0xdf   : > { %1216 = vmatpush2.bf16.msra.mxu0 %v726_v23 }
  0xe0   : > { %v615_v26 = vpop.permute.xlu1 %614  ;;  %v610_v27 = vpop.permute.xlu0 %609  ;;  %1217 = vmatprep.subr.bf16.mxu0 %v2457_v2 }
  0xe1   : > { %v651_v28 = vadd.f32 %v615_v26, %v490_v24  ;;  %v650_v29 = vadd.f32 %v610_v27, %v489_v25  ;;  %v2360_v24 = vld [vmem:[%s3318_s3 + $0x110] ss:$8 sps:$4 sm:$0xff]   ;;  %v2361_v25 = vld [vmem:[%s3318_s3 + $0x124] ss:$8 sps:$4 sm:$0x3f]  }
  0xe3   : > { %v674_v30 = vmax.f32 %v651_v28, 0.0  ;;  %v673_v31 = vmax.f32 %v650_v29, 0.0  ;;  %v2363_v29 = vld [vmem:[%s3318_s3 + $0x120] ss:$8 sps:$4 sm:$0x3f]  }
  0xe4   : > { %v438_v32 = vpop.permute.xlu1 %437  ;;  %v433_v33 = vpop.permute.xlu0 %432 }
  0xe5   : > { %v725_v34 = vpack.c.bf16 %v674_v30, %v673_v31  ;;  %v488_v35 = vmul.f32 %v2757_v0, %v438_v32  ;;  %v487_v36 = vmul.f32 %v2757_v0, %v433_v33  ;;  %v2313_v0 = vld [vmem:[%s3318_s3 + $0x24] ss:$8 sps:$4 sm:$0xff]  }
  0xe7   : > { %1218 = vmatpush2.bf16.msra.mxu0 %v725_v34 }
  0xe8   : > { %v605_v37 = vpop.permute.xlu1 %604  ;;  %v600_v38 = vpop.permute.xlu0 %599  ;;  %1219 = vmatprep.subr.bf16.mxu0 %v2457_v2  ;;  %v2312_v2 = vld [vmem:[%s3318_s3 + $0x10] ss:$8 sps:$4 sm:$0xff]  }
  0xe9   : > { %v649_v39 = vadd.f32 %v605_v37, %v488_v35  ;;  %v648_v40 = vadd.f32 %v600_v38, %v487_v36 }
  0xeb   : > { %v672_v41 = vmax.f32 %v649_v39, 0.0  ;;  %v671_v42 = vmax.f32 %v648_v40, 0.0 }
  0xec   : > { %v3004_v8 = vpop.permute.xlu0 %918  ;;  %v3007_v9 = vpop.permute.xlu1 %923 }
  0xed   : > { %v724_v43 = vpack.c.bf16 %v672_v41, %v671_v42 }
  0xef   : > { %1220 = vmatpush2.bf16.msra.mxu0 %v724_v43 }
  0xf0   : > { %v3015_v12 = vpop.permute.xlu0 %838  ;;  %v3017_v13 = vpop.permute.xlu1 %843 }
  0xf2   : > { %1222 = vmatmul.mubr.bf16.vlgmr.msra.gmra.mxu0 %v2307_v44 }
  0xf3   : > { %2081 = vmatprep.mubr.msk.bf16.mxu0 %vm1127_vm0, %v2310_v45 }
  0xf4   : > { %v3020_v14 = vpop.permute.xlu0 %908  ;;  %v3028_v17 = vpop.permute.xlu1 %913 }
  0xf8   : > { %v3031_v18 = vpop.permute.xlu0 %828  ;;  %v3033_v19 = vpop.permute.xlu1 %833 }
  0xfa   : > { %1230 = vmatmul.mubr.bf16.gmra.mxu0 %v2312_v2 }
  0xfb   : > { %2082 = vmatprep.mubr.msk.bf16.mxu0 %vm1127_vm0, %v2313_v0 }
  0xfc   : > { %v3041_v22 = vpop.permute.xlu0 %898  ;;  %v3044_v23 = vpop.permute.xlu1 %903 }
 0x100   : > { %v3052_v26 = vpop.permute.xlu0 %818  ;;  %v3054_v27 = vpop.permute.xlu1 %823 }
 0x102   : > { %1238 = vmatmul.mubr.bf16.gmra.mxu0 %v2315_v46 }
 0x103   : > { %2083 = vmatprep.mubr.msk.bf16.mxu0 %vm1127_vm0, %v2316_v47 }
 0x104   : > { %v3057_v28 = vpop.permute.xlu0 %888  ;;  %v3062_v30 = vpop.permute.xlu1 %893 }
 0x108   : > { %v809_v31 = vpop.permute.xlu0 %808  ;;  %v814_v32 = vpop.permute.xlu1 %813 }
 0x10a   : > { %1246 = vmatmul.mubr.bf16.gmra.mxu0 %v2318_v48 }
 0x10b   : > { %2084 = vmatprep.mubr.msk.bf16.mxu0 %vm1127_vm0, %v2319_v49 }
 0x10c   : > { %v3064_v33 = vpop.permute.xlu0 %878  ;;  %v3066_v34 = vpop.permute.xlu1 %883 }
 0x110   : > { %v799_v35 = vpop.permute.xlu0 %798  ;;  %v804_v36 = vpop.permute.xlu1 %803 }
 0x112   : > { %1254 = vmatmul.mubr.bf16.gmra.mxu0 %v2321_v50 }
 0x113   : > { %2085 = vmatprep.mubr.msk.bf16.mxu0 %vm1127_vm0, %v2322_v51 }
 0x114   : > { %v3068_v37 = vpop.permute.xlu0 %868  ;;  %v3070_v38 = vpop.permute.xlu1 %873 }
 0x118   : > { %v789_v39 = vpop.permute.xlu0 %788  ;;  %v794_v40 = vpop.permute.xlu1 %793 }
 0x11a   : > { %1262 = vmatmul.mubr.bf16.gmra.mxu0 %v2324_v52 }
 0x11b   : > { %2086 = vmatprep.mubr.msk.bf16.mxu0 %vm1127_vm0, %v2325_v53 }
 0x11c   : > { %v3072_v41 = vpop.permute.xlu0 %858  ;;  %v3074_v42 = vpop.permute.xlu1 %863 }
 0x120   : > { %v779_v43 = vpop.permute.xlu0 %778  ;;  %v784_v44 = vpop.permute.xlu1 %783 }
 0x122   : > { %1270 = vmatmul.mubr.bf16.gmra.mxu0 %v2327_v54 }
 0x123   : > { %2087 = vmatprep.mubr.msk.bf16.mxu0 %vm1127_vm0, %v2328_v55 }
 0x124   : > { %v3076_v45 = vpop.permute.xlu0 %848  ;;  %v3078_v2 = vpop.permute.xlu1 %853 }
 0x128   : > { %v769_v46 = vpop.permute.xlu0 %768  ;;  %v774_v49 = vpop.permute.xlu1 %773 }
 0x12a   : > { %1278 = vmatmul.mubr.bf16.gmra.mxu0 %v2330_v56 }
 0x12b   : > { %2088 = vmatprep.mubr.msk.bf16.mxu0 %vm1127_vm0, %v2331_v57 }
 0x132   : > { %1286 = vmatmul.mubr.bf16.gmra.mxu0 %v2333_v58 }
 0x133   : > { %2089 = vmatprep.mubr.msk.bf16.mxu0 %vm1127_vm0, %v2334_v59 }
 0x13a   : > { %1294 = vmatmul.mubr.bf16.gmra.mxu0 %v2336_v60 }
 0x13b   : > { %2090 = vmatprep.mubr.msk.bf16.mxu0 %vm1127_vm0, %v2337_v61 }
 0x142   : > { %1302 = vmatmul.mubr.bf16.gmra.mxu0 %v2339_v62 }
 0x143   : > { %2091 = vmatprep.mubr.msk.bf16.mxu0 %vm1127_vm0, %v2340_v63 }
 0x14a   : > { %1310 = vmatmul.mubr.bf16.gmra.mxu0 %v2342_v1 }
 0x14b   : > { %2092 = vmatprep.mubr.msk.bf16.mxu0 %vm1127_vm0, %v2343_v3 }
 0x152   : > { %1318 = vmatmul.mubr.bf16.gmra.mxu0 %v2345_v4 }
 0x153   : > { %2093 = vmatprep.mubr.msk.bf16.mxu0 %vm1127_vm0, %v2346_v5 }
 0x15a   : > { %1326 = vmatmul.mubr.bf16.gmra.mxu0 %v2348_v6 }
 0x15b   : > { %2094 = vmatprep.mubr.msk.bf16.mxu0 %vm1127_vm0, %v2349_v7 }
 0x162   : > { %1334 = vmatmul.mubr.bf16.gmra.mxu0 %v2351_v10 }
 0x163   : > { %2095 = vmatprep.mubr.msk.bf16.mxu0 %vm1127_vm0, %v2352_v11 }
 0x16a   : > { %1342 = vmatmul.mubr.bf16.gmra.mxu0 %v2354_v15 }
 0x16b   : > { %2096 = vmatprep.mubr.msk.bf16.mxu0 %vm1127_vm0, %v2355_v16 }
 0x172   : > { %1350 = vmatmul.mubr.bf16.gmra.mxu0 %v2357_v20 }
 0x173   : > { %2097 = vmatprep.mubr.msk.bf16.mxu0 %vm1127_vm0, %v2358_v21 }
 0x17a   : > { %1358 = vmatmul.mubr.bf16.gmra.mxu0 %v2360_v24 }
 0x17b   : > { %2098 = vmatprep.mubr.msk.bf16.mxu0 %vm1127_vm0, %v2361_v25 }
 0x182   : > { %1366 = vmatmul.mubr.bf16.gmra.mxu0 %v2363_v29 }
 0x1b2   : > { %v1223_v0 = vpop.f32.mrf.mxu0 }
 0x1b3   : > { %v1224_v48 = vadd.f32 %v1223_v0, %v769_v46 }
 0x1b4   : > { %v1225_v47 = vpop.f32.mrf.mxu0 }
 0x1b5   : > { %v1374_v53 = vmax.f32 %v1224_v48, 0.0 }
 0x1b6   : > { %v1226_v50 = vpop.f32.mrf.mxu0 }
 0x1b7   : > { %v1227_v51 = vadd.f32 %v1226_v50, %v774_v49 }
 0x1b8   : > { %v1228_v52 = vpop.f32.mrf.mxu0 }
 0x1b9   : > { %v1375_v54 = vmax.f32 %v1227_v51, 0.0 }
 0x1ba   : > { %v1231_v55 = vpop.f32.mrf.mxu0 }
 0x1bb   : > { %v3080_v56 = vpack.c.bf16 %v1375_v54, %v1374_v53  ;;  %v1232_v58 = vadd.f32 %v1231_v55, %v779_v43 }
 0x1bc   : > { %v1233_v57 = vpop.f32.mrf.mxu0 }
 0x1bd   : > { %v1376_v62 = vmax.f32 %v1232_v58, 0.0 }
 0x1be   : > { %v1234_v59 = vpop.f32.mrf.mxu0 }
 0x1bf   : > { %v1235_v60 = vadd.f32 %v1234_v59, %v784_v44 }
 0x1c0   : > { %v1236_v61 = vpop.f32.mrf.mxu0 }
 0x1c1   : > { %v1377_v63 = vmax.f32 %v1235_v60, 0.0 }
 0x1c2   : > { %v1239_v1 = vpop.f32.mrf.mxu0 }
 0x1c3   : > { %v3082_v3 = vpack.c.bf16 %v1377_v63, %v1376_v62  ;;  %v1240_v5 = vadd.f32 %v1239_v1, %v789_v39  ;;  %v2366_v39 = vld [vmem:[%s3320_s5 + $0x4] ss:$12 sps:$4 sm:$0xff]  }
 0x1c4   : > { %v1241_v4 = vpop.f32.mrf.mxu0  ;;  %1727 = vmatprep.mubr.bf16.mxu1 %v2366_v39 }
 0x1c5   : > { %v1378_v11 = vmax.f32 %v1240_v5, 0.0 }
 0x1c6   : > { %v1242_v6 = vpop.f32.mrf.mxu0 }
 0x1c7   : > { %v1243_v7 = vadd.f32 %v1242_v6, %v794_v40 }
 0x1c8   : > { %v1244_v10 = vpop.f32.mrf.mxu0 }
 0x1c9   : > { %v1379_v15 = vmax.f32 %v1243_v7, 0.0 }
 0x1ca   : > { %v1247_v16 = vpop.f32.mrf.mxu0 }
 0x1cb   : > { %v3084_v20 = vpack.c.bf16 %v1379_v15, %v1378_v11  ;;  %v1248_v24 = vadd.f32 %v1247_v16, %v799_v35 }
 0x1cc   : > { %v1249_v21 = vpop.f32.mrf.mxu0 }
 0x1cd   : > { %v1380_v44 = vmax.f32 %v1248_v24, 0.0 }
 0x1ce   : > { %v1250_v25 = vpop.f32.mrf.mxu0 }
 0x1cf   : > { %v1251_v29 = vadd.f32 %v1250_v25, %v804_v36 }
 0x1d0   : > { %v1252_v43 = vpop.f32.mrf.mxu0 }
 0x1d1   : > { %v1381_v0 = vmax.f32 %v1251_v29, 0.0 }
 0x1d2   : > { %v1255_v46 = vpop.f32.mrf.mxu0 }
 0x1d3   : > { %v3086_v47 = vpack.c.bf16 %v1381_v0, %v1380_v44  ;;  %v1256_v48 = vadd.f32 %v1255_v46, %v809_v31 }
 0x1d4   : > { %v1257_v40 = vpop.f32.mrf.mxu0 }
 0x1d5   : > { %v1382_v52 = vmax.f32 %v1256_v48, 0.0 }
 0x1d6   : > { %v1258_v49 = vpop.f32.mrf.mxu0 }
 0x1d7   : > { %v1259_v50 = vadd.f32 %v1258_v49, %v814_v32 }
 0x1d8   : > { %v1260_v51 = vpop.f32.mrf.mxu0 }
 0x1d9   : > { %v1383_v35 = vmax.f32 %v1259_v50, 0.0 }
 0x1da   : > { %v1263_v53 = vpop.f32.mrf.mxu0 }
 0x1db   : > { %v3091_v36 = vpack.c.bf16 %v1383_v35, %v1382_v52  ;;  %v1264_v55 = vadd.f32 %v1263_v53, %v3052_v26 }
 0x1dc   : > { %v1265_v54 = vpop.f32.mrf.mxu0 }
 0x1dd   : > { %v1384_v60 = vmax.f32 %v1264_v55, 0.0 }
 0x1de   : > { %v1266_v57 = vpop.f32.mrf.mxu0 }
 0x1df   : > { %v1267_v58 = vadd.f32 %v1266_v57, %v3054_v27 }
 0x1e0   : > { %v1268_v59 = vpop.f32.mrf.mxu0 }
 0x1e1   : > { %v1385_v61 = vmax.f32 %v1267_v58, 0.0 }
 0x1e2   : > { %v1271_v62 = vpop.f32.mrf.mxu0 }
 0x1e3   : > { %v3095_v31 = vpack.c.bf16 %v1385_v61, %v1384_v60  ;;  %v1272_v32 = vadd.f32 %v1271_v62, %v3031_v18 }
 0x1e4   : > { %v1273_v63 = vpop.f32.mrf.mxu0 }
 0x1e5   : > { %v1386_v6 = vmax.f32 %v1272_v32, 0.0 }
 0x1e6   : > { %v1274_v1 = vpop.f32.mrf.mxu0 }
 0x1e7   : > { %v1275_v4 = vadd.f32 %v1274_v1, %v3033_v19 }
 0x1e8   : > { %v1276_v5 = vpop.f32.mrf.mxu0 }
 0x1e9   : > { %v1387_v7 = vmax.f32 %v1275_v4, 0.0 }
 0x1ea   : > { %v1279_v10 = vpop.f32.mrf.mxu0 }
 0x1eb   : > { %v3099_v26 = vpack.c.bf16 %v1387_v7, %v1386_v6  ;;  %v1280_v27 = vadd.f32 %v1279_v10, %v3015_v12 }
 0x1ec   : > { %v1281_v11 = vpop.f32.mrf.mxu0 }
 0x1ed   : > { %v1388_v24 = vmax.f32 %v1280_v27, 0.0 }
 0x1ee   : > { %v1282_v15 = vpop.f32.mrf.mxu0 }
 0x1ef   : > { %v1283_v16 = vadd.f32 %v1282_v15, %v3017_v13 }
 0x1f0   : > { %v1284_v21 = vpop.f32.mrf.mxu0 }
 0x1f1   : > { %v1389_v25 = vmax.f32 %v1283_v16, 0.0 }
 0x1f2   : > { %v1287_v29 = vpop.f32.mrf.mxu0 }
 0x1f3   : > { %v1449_v18 = vpack.c.bf16 %v1389_v25, %v1388_v24  ;;  %v1288_v19 = vadd.f32 %v1287_v29, %v3076_v45 }
 0x1f4   : > { %v1289_v43 = vpop.f32.mrf.mxu0 }
 0x1f5   : > { %v1390_v39 = vmax.f32 %v1288_v19, 0.0 }
 0x1f6   : > { %v1290_v44 = vpop.f32.mrf.mxu0 }
 0x1f7   : > { %v1291_v0 = vadd.f32 %v1290_v44, %v3078_v2 }
 0x1f8   : > { %v1292_v46 = vpop.f32.mrf.mxu0 }
 0x1f9   : > { %v1391_v40 = vmax.f32 %v1291_v0, 0.0 }
 0x1fa   : > { %v1295_v48 = vpop.f32.mrf.mxu0 }
 0x1fb   : > { %v3105_v49 = vpack.c.bf16 %v1391_v40, %v1390_v39  ;;  %v1296_v13 = vadd.f32 %v1295_v48, %v3072_v41 }
 0x1fc   : > { %v1297_v12 = vpop.f32.mrf.mxu0 }
 0x1fd   : > { %v1392_v35 = vmax.f32 %v1296_v13, 0.0 }
 0x1fe   : > { %v1298_v50 = vpop.f32.mrf.mxu0 }
 0x1ff   : > { %v1299_v51 = vadd.f32 %v1298_v50, %v3074_v42 }
 0x200   : > { %v1300_v52 = vpop.f32.mrf.mxu0 }
 0x201   : > { %v1393_v53 = vmax.f32 %v1299_v51, 0.0 }
 0x202   : > { %v1303_v54 = vpop.f32.mrf.mxu0 }
 0x203   : > { %v3109_v45 = vpack.c.bf16 %v1393_v53, %v1392_v35 }
 0x204   : > { %v1305_v55 = vpop.f32.mrf.mxu0 }
 0x206   : > { %v1306_v2 = vpop.f32.mrf.mxu0 }
 0x208   : > { %v1308_v57 = vpop.f32.mrf.mxu0 }
 0x20a   : > { %v1311_v58 = vpop.f32.mrf.mxu0 }
 0x20b   : > { %v1312_v55 = vadd.f32 %v1311_v58, %v3064_v33  ;;  %v954_v58 = vpop.permute.xlu1 %953 }
 0x20c   : > { %v1313_v59 = vpop.f32.mrf.mxu0 }
 0x20d   : > { %v1307_v59 = vadd.f32 %v1306_v2, %v3070_v38  ;;  %v949_v2 = vpop.permute.xlu0 %948 }
 0x20e   : > { %v1314_v60 = vpop.f32.mrf.mxu0 }
 0x20f   : > { %v1315_v52 = vadd.f32 %v1314_v60, %v3066_v34  ;;  %v1396_v34 = vmax.f32 %v1312_v55, 0.0  ;;  %v2458_v55 = vmov 0.0  }
 0x210   : > { %v1316_v61 = vpop.f32.mrf.mxu0 }
 0x212   : > { %v1319_v62 = vpop.f32.mrf.mxu0 }
 0x214   : > { %v1321_v63 = vpop.f32.mrf.mxu0 }
 0x215   : > { %v1395_v63 = vmax.f32 %v1307_v59, 0.0 }
 0x216   : > { %v1322_v32 = vpop.f32.mrf.mxu0 }
 0x218   : > { %v1324_v41 = vpop.f32.mrf.mxu0 }
 0x21a   : > { %v1327_v1 = vpop.f32.mrf.mxu0 }
 0x21b   : > { %v1328_v40 = vadd.f32 %v1327_v1, %v3041_v22 }
 0x21c   : > { %v1329_v4 = vpop.f32.mrf.mxu0 }
 0x21e   : > { %v1330_v42 = vpop.f32.mrf.mxu0 }
 0x21f   : > { %v1331_v19 = vadd.f32 %v1330_v42, %v3044_v23  ;;  %v1400_v23 = vmax.f32 %v1328_v40, 0.0  ;;  %v939_v42 = vpop.permute.xlu0 %938  ;;  %v2379_v40 = vld [vmem:[%s3320_s5 + $0x7c] ss:$12 sps:$4 sm:$0xff]  }
 0x220   : > { %v1332_v5 = vpop.f32.mrf.mxu0 }
 0x221   : > { %v1401_v13 = vmax.f32 %v1331_v19, 0.0  ;;  %v2372_v19 = vld [vmem:[%s3320_s5 + $0x30] ss:$12 sps:$4 sm:$0xff]  }
 0x222   : > { %v1335_v6 = vpop.f32.mrf.mxu0 }
 0x223   : > { %v1336_v25 = vadd.f32 %v1335_v6, %v3020_v14  ;;  %v1455_v53 = vpack.c.bf16 %v1401_v13, %v1400_v23  ;;  %v2389_v23 = vld [vmem:[%s3320_s5 + $0x38] ss:$12 sps:$4 sm:$0xff]  }
 0x224   : > { %v1337_v7 = vpop.f32.mrf.mxu0 }
 0x225   : > { %v1402_v48 = vmax.f32 %v1336_v25, 0.0 }
 0x226   : > { %v1338_v10 = vpop.f32.mrf.mxu0 }
 0x227   : > { %v1339_v16 = vadd.f32 %v1338_v10, %v3028_v17 }
 0x228   : > { %v1340_v11 = vpop.f32.mrf.mxu0 }
 0x229   : > { %v1403_v44 = vmax.f32 %v1339_v16, 0.0 }
 0x22a   : > { %v1343_v27 = vpop.f32.mrf.mxu0 }
 0x22b   : > { %v1344_v21 = vadd.f32 %v1343_v27, %v3004_v8  ;;  %v1323_v8 = vadd.f32 %v1322_v32, %v3062_v30  ;;  %v1456_v50 = vpack.c.bf16 %v1403_v44, %v1402_v48  ;;  %v2373_v44 = vld [vmem:[%s3320_s5 + $0x4c] ss:$12 sps:$4 sm:$0xff]  }
 0x22c   : > { %v1345_v15 = vpop.f32.mrf.mxu0  ;;  %v2381_v48 = vld [vmem:[%s3320_s5 + $0x78] ss:$12 sps:$4 sm:$0xff]  }
 0x22d   : > { %v1404_v0 = vmax.f32 %v1344_v21, 0.0  ;;  %v1399_v35 = vmax.f32 %v1323_v8, 0.0  ;;  %v929_v15 = vpop.permute.xlu0 %928  ;;  %v2384_v8 = vld [vmem:[%s3320_s5 + $0x90] ss:$12 sps:$4 sm:$0xff]  }
 0x22e   : > { %v1346_v24 = vpop.f32.mrf.mxu0 }
 0x22f   : > { %v1347_v29 = vadd.f32 %v1346_v24, %v3007_v9  ;;  %v1320_v9 = vadd.f32 %v1319_v62, %v3057_v28  ;;  %v1304_v62 = vadd.f32 %v1303_v54, %v3068_v37  ;;  %v944_v54 = vpop.permute.xlu1 %943 }
 0x230   : > { %v1348_v43 = vpop.f32.mrf.mxu0 }
 0x231   : > { %v1405_v46 = vmax.f32 %v1347_v29, 0.0  ;;  %v1398_v30 = vmax.f32 %v1320_v9, 0.0  ;;  %v1394_v33 = vmax.f32 %v1304_v62, 0.0  ;;  %v2370_v43 = vld [vmem:[%s3320_s5 + $0x34] ss:$12 sps:$4 sm:$0xff]  }
 0x232   : > { %v3116_v39 = vpop.f32.mrf.mxu0  ;;  %v2388_v9 = vld [vmem:[%s3320_s5 + $0x20] ss:$12 sps:$4 sm:$0xff]  }
 0x233   : > { %v1457_v12 = vpack.c.bf16 %v1405_v46, %v1404_v0  ;;  %v1454_v61 = vpack.c.bf16 %v1399_v35, %v1398_v30  ;;  %v1452_v38 = vpack.c.bf16 %v1395_v63, %v1394_v33  ;;  %v934_v10 = vpop.permute.xlu1 %933  ;;  %v2375_v0 = vld [vmem:[%s3320_s5 + $0x48] ss:$12 sps:$4 sm:$0xff]   ;;  %v2376_v46 = vld [vmem:[%s3320_s5 + $0x64] ss:$12 sps:$4 sm:$0xff]   ;;  %v2392_v35 = vld [vmem:[%s3320_s5 + $0x80] ss:$12 sps:$4 sm:$0xff]  }
 0x234   : > { %v1353_v17 = vpop.f32.mrf.mxu0 }
 0x235   : > { %2136 = vmatprep.subr.bf16.mxu1 %v1457_v12  ;;  %v2382_v12 = vld [vmem:[%s3320_s5 + $0x94] ss:$12 sps:$4 sm:$0xff]   ;;  %v1440_v17 = vld [vmem:[%s3320_s5 + $0xa8] sm:$0xff] }
 0x236   : > { %v1354_v14 = vpop.f32.mrf.mxu0  ;;  %2137 = vmatpush3.bf16.msra.mxu1 %v1449_v18  ;;  %v1397_v18 = vmax.f32 %v1315_v52, 0.0  ;;  %v2121_v13 = vcombine.high %v1440_v17, %v1440_v17  ;;  %v2391_v52 = vld [vmem:[%s3320_s5 + $0x68] ss:$12 sps:$4 sm:$0xff]  }
 0x237   : > { %2138 = vmatprep.subr.bf16.mxu1 %v1456_v50  ;;  %v2120_v50 = vcombine.low %v1440_v17, %v1440_v17 }
 0x238   : > { %v1356_v51 = vpop.f32.mrf.mxu0  ;;  %v1453_v32 = vpack.c.bf16 %v1397_v18, %v1396_v34 }
 0x239   : > { %v2390_v51 = vld [vmem:[%s3320_s5 + $0x50] ss:$12 sps:$4 sm:$0xff]  }
 0x23a   : > { %v1359_v22 = vpop.f32.mrf.mxu0  ;;  %2139 = vmatpush3.bf16.msra.mxu1 %v3099_v26 }
 0x23b   : > { %2140 = vmatprep.subr.bf16.mxu1 %v1455_v53  ;;  %v1360_v6 = vadd.f32 %v1359_v22, %v939_v42  ;;  %v2393_v53 = vld [vmem:[%s3320_s5 + $0x98] ss:$12 sps:$4 sm:$0xff]   ;;  %v2394_v22 = vld [vmem:[%s3320_s5 + $0xb0] ss:$0 sps:$4 sm:$0xff]  }
 0x23c   : > { %v1361_v57 = vpop.f32.mrf.mxu0 }
 0x23d   : > { %v1408_v16 = vmax.f32 %v1360_v6, 0.0 }
 0x23e   : > { %v1362_v28 = vpop.f32.mrf.mxu0  ;;  %2141 = vmatpush3.bf16.msra.mxu1 %v3095_v31 }
 0x23f   : > { %2142 = vmatprep.subr.bf16.mxu1 %v1454_v61 }
 0x240   : > { %v1364_v60 = vpop.f32.mrf.mxu0 }
 0x242   : > { %v1367_v26 = vpop.f32.mrf.mxu0  ;;  %2143 = vmatpush3.bf16.msra.mxu1 %v3091_v36  ;;  %v1363_v36 = vadd.f32 %v1362_v28, %v944_v54 }
 0x243   : > { %2144 = vmatprep.subr.bf16.mxu1 %v1453_v32  ;;  %v1368_v4 = vadd.f32 %v1367_v26, %v949_v2 }
 0x244   : > { %v1369_v41 = vpop.f32.mrf.mxu0  ;;  %v1409_v11 = vmax.f32 %v1363_v36, 0.0  ;;  %v3217_v36 = vpop.permute.xlu1 %1538 }
 0x245   : > { %v1410_v7 = vmax.f32 %v1368_v4, 0.0 }
 0x246   : > { %v1370_v1 = vpop.f32.mrf.mxu0  ;;  %2145 = vmatpush3.bf16.msra.mxu1 %v3086_v47  ;;  %v1355_v47 = vadd.f32 %v1354_v14, %v934_v10  ;;  %v1459_v21 = vpack.c.bf16 %v1409_v11, %v1408_v16  ;;  %v2387_v14 = vld [vmem:[%s3320_s5 + $0x8] ss:$12 sps:$4 sm:$0xff]  }
 0x247   : > { %2146 = vmatprep.subr.bf16.mxu1 %v1452_v38  ;;  %v1371_v37 = vadd.f32 %v1370_v1, %v954_v58 }
 0x248   : > { %v1372_v31 = vpop.f32.mrf.mxu0 }
 0x249   : > { %v1411_v5 = vmax.f32 %v1371_v37, 0.0  ;;  %v3215_v37 = vpop.permute.xlu0 %1548 }
 0x24a   : > { %2147 = vmatpush3.bf16.msra.mxu1 %v3084_v20  ;;  %v2364_v20 = vld [vmem:[%s3320_s5] ss:$12 sps:$4 sm:$0xff]  }
 0x24b   : > { %2148 = vmatprep.subr.bf16.mxu1 %v3109_v45  ;;  %v1460_v27 = vpack.c.bf16 %v1411_v5, %v1410_v7  ;;  %v1352_v45 = vadd.f32 %v3116_v39, %v929_v15  ;;  %v2378_v39 = vld [vmem:[%s3320_s5 + $0x60] ss:$12 sps:$4 sm:$0xff]  }
 0x24d   : > { %v1693_v24 = vsel %vm1691_vm2, %v1460_v27, 0  ;;  %v1406_v25 = vmax.f32 %v1352_v45, 0.0  ;;  %v3219_v7 = vpop.permute.xlu0 %1543 }
 0x24e   : > { %2149 = vmatpush3.bf16.msra.mxu1 %v3082_v3  ;;  %v2367_v3 = vld [vmem:[%s3320_s5 + $0x1c] ss:$12 sps:$4 sm:$0xff]  }
 0x24f   : > { %2150 = vmatprep.subr.bf16.mxu1 %v3105_v49  ;;  %v1407_v49 = vmax.f32 %v1355_v47, 0.0 }
 0x251   : > { %v1458_v29 = vpack.c.bf16 %v1407_v49, %v1406_v25  ;;  %v3227_v15 = vpop.permute.xlu0 %1533 }
 0x252   : > { %2151 = vmatpush3.bf16.msra.mxu1 %v3080_v56  ;;  %v2369_v56 = vld [vmem:[%s3320_s5 + $0x18] ss:$12 sps:$4 sm:$0xff]  }
 0x253   : > { %2262 = vmatprep.subr.msk.bf16.mxu1 %vm1691_vm2, %v1460_v27  ;;  %v3223_v27 = vpop.permute.xlu1 %1528 }
 0x255   : > { %1728 = vmatmul.mubr.bf16.vlgmr.msra.gmra.mxu1 %v2364_v20 }
 0x256   : > { %2221 = vmatpush3.bf16.msra.mxu1 %v1693_v24  ;;  %1735 = vmatprep.mubr.bf16.mxu1 %v2367_v3 }
 0x257   : > { %2222 = vmatprep.subr.bf16.mxu1 %v1459_v21  ;;  %v3233_v16 = vpop.permute.xlu1 %1518 }
 0x25a   : > { %2223 = vmatpush3.bf16.msra.mxu1 %v1459_v21  ;;  %v3237_v21 = vpop.permute.xlu0 %1523 }
 0x25b   : > { %2224 = vmatprep.subr.bf16.mxu1 %v1458_v29 }
 0x25d   : > { %1736 = vmatmul.mubr.bf16.gmra.mxu1 %v2369_v56 }
 0x25e   : > { %2225 = vmatpush3.bf16.msra.mxu1 %v1458_v29  ;;  %1743 = vmatprep.mubr.bf16.mxu1 %v2370_v43  ;;  %v1509_v29 = vpop.permute.xlu1 %1508  ;;  %v1514_v43 = vpop.permute.xlu0 %1513 }
 0x25f   : > { %2242 = vmatprep.subr.bf16.mxu1 %v2458_v55 }
 0x265   : > { %1744 = vmatmul.mubr.bf16.gmra.mxu1 %v2372_v19 }
 0x266   : > { %1751 = vmatprep.mubr.bf16.mxu1 %v2373_v44 }
 0x26d   : > { %1752 = vmatmul.mubr.bf16.gmra.mxu1 %v2375_v0  ;;  %v1499_v0 = vpop.permute.xlu1 %1498 }
 0x26e   : > { %1759 = vmatprep.mubr.bf16.mxu1 %v2376_v46 }
 0x275   : > { %1760 = vmatmul.mubr.bf16.gmra.mxu1 %v2378_v39  ;;  %v1504_v39 = vpop.permute.xlu0 %1503 }
 0x276   : > { %1767 = vmatprep.mubr.bf16.mxu1 %v2379_v40 }
 0x27d   : > { %1768 = vmatmul.mubr.bf16.gmra.mxu1 %v2381_v48 }
 0x27e   : > { %1775 = vmatprep.mubr.bf16.mxu1 %v2382_v12  ;;  %v1489_v12 = vpop.permute.xlu1 %1488 }
 0x285   : > { %1776 = vmatmul.mubr.bf16.gmra.mxu1 %v2384_v8  ;;  %v1494_v8 = vpop.permute.xlu0 %1493 }
 0x286   : > { %1783 = vmatprep.mubr.bf16.mxu1 %v2121_v13 }
 0x28d   : > { %1784 = vmatmul.mubr.bf16.gmra.mxu1 %v2120_v50 }
 0x28e   : > { %2226 = vmatprep.mubr.msk.bf16.mxu1 %vm1666_vm3, %v2387_v14 }
 0x295   : > { %2227 = vmatmul.mubr.msk.bf16.vlgmr.msra.gmra.mxu1 %vm1666_vm3, %v2388_v9  ;;  %v1479_v9 = vpop.permute.xlu1 %1478 }
 0x296   : > { %2230 = vmatprep.mubr.msk.bf16.mxu1 %vm1666_vm3, %v2389_v23 }
 0x29d   : > { %2231 = vmatmul.mubr.msk.bf16.gmra.mxu1 %vm1666_vm3, %v2390_v51 }
 0x29e   : > { %2234 = vmatprep.mubr.msk.bf16.mxu1 %vm1666_vm3, %v2391_v52 }
 0x2a5   : > { %2235 = vmatmul.mubr.msk.bf16.gmra.mxu1 %vm1666_vm3, %v2392_v35 }
 0x2a6   : > { %2238 = vmatprep.mubr.msk.bf16.mxu1 %vm1666_vm3, %v2393_v53  ;;  %v1484_v53 = vpop.permute.xlu0 %1483 }
 0x2ad   : > { %2239 = vmatmul.mubr.msk.bf16.gmra.mxu1 %vm1666_vm3, %v2394_v22 }
 0x2ae   : > { %2258 = vmatprep.mubr.msk.bf16.mxu1 %vm2459_vm4, %v2458_v55 }
 0x315   : > { %v2152_v30 = vpop.f32.mrf.mxu1 }
 0x317   : > { %v2153_v57 = vpop.f32.mrf.mxu1 }
 0x318   : > { %v2154_v59 = vadd.f32 %v2153_v57, %v2152_v30 }
 0x319   : > { %v2155_v18 = vpop.f32.mrf.mxu1 }
 0x31a   : > { %v1730_v52 = vadd.f32 %v2154_v59, %v1479_v9 }
 0x31b   : > { %v2156_v61 = vpop.f32.mrf.mxu1 }
 0x31c   : > { %v2157_v28 = vadd.f32 %v2156_v61, %v2155_v18 }
 0x31d   : > { %v2158_v62 = vpop.f32.mrf.mxu1 }
 0x31e   : > { %v1733_v18 = vadd.f32 %v2157_v28, %v1484_v53 }
 0x31f   : > { %v2159_v34 = vpop.f32.mrf.mxu1 }
 0x320   : > { %v2160_v60 = vadd.f32 %v2159_v34, %v2158_v62 }
 0x321   : > { %v2161_v63 = vpop.f32.mrf.mxu1 }
 0x322   : > { %v1738_v14 = vadd.f32 %v2160_v60, %v1489_v12 }
 0x323   : > { %v2162_v32 = vpop.f32.mrf.mxu1 }
 0x324   : > { %v2163_v26 = vadd.f32 %v2162_v32, %v2161_v63 }
 0x325   : > { %v2164_v33 = vpop.f32.mrf.mxu1 }
 0x326   : > { %v1741_v35 = vadd.f32 %v2163_v26, %v1494_v8 }
 0x327   : > { %v2165_v58 = vpop.f32.mrf.mxu1 }
 0x328   : > { %v3211_v41 = vadd.f32 %v2165_v58, %v2164_v33 }
 0x329   : > { %v2167_v38 = vpop.f32.mrf.mxu1 }
 0x32a   : > { %v1746_v26 = vadd.f32 %v3211_v41, %v1499_v0 }
 0x32b   : > { %v2168_v2 = vpop.f32.mrf.mxu1 }
 0x32c   : > { %v3213_v1 = vadd.f32 %v2168_v2, %v2167_v38 }
 0x32d   : > { %v2170_v31 = vpop.f32.mrf.mxu1 }
 0x32f   : > { %v2171_v54 = vpop.f32.mrf.mxu1 }
 0x330   : > { %v2172_v4 = vadd.f32 %v2171_v54, %v2170_v31 }
 0x331   : > { %v2173_v42 = vpop.f32.mrf.mxu1 }
 0x332   : > { %v1754_v60 = vadd.f32 %v2172_v4, %v1509_v29 }
 0x333   : > { %v2174_v5 = vpop.f32.mrf.mxu1 }
 0x334   : > { %v2175_v6 = vadd.f32 %v2174_v5, %v2173_v42 }
 0x335   : > { %v2176_v10 = vpop.f32.mrf.mxu1 }
 0x336   : > { %v1757_v54 = vadd.f32 %v2175_v6, %v1514_v43 }
 0x337   : > { %v2177_v47 = vpop.f32.mrf.mxu1 }
 0x338   : > { %v3221_v11 = vadd.f32 %v2177_v47, %v2176_v10  ;;  %v1749_v10 = vadd.f32 %v3213_v1, %v1504_v39 }
 0x339   : > { %v3225_v20 = vpop.f32.mrf.mxu1 }
 0x33b   : > { %v3229_v3 = vpop.f32.mrf.mxu1 }
 0x33d   : > { %v3231_v45 = vpop.f32.mrf.mxu1 }
 0x33f   : > { %v3235_v49 = vpop.f32.mrf.mxu1 }
 0x340   : > { %v2184_v53 = vadd.f32 %v3235_v49, %v3231_v45 }
 0x341   : > { %v2185_v24 = vpop.f32.mrf.mxu1 }
 0x343   : > { %v2186_v25 = vpop.f32.mrf.mxu1 }
 0x344   : > { %v2187_v0 = vadd.f32 %v2186_v25, %v2185_v24 }
 0x345   : > { %v2188_v56 = vpop.f32.mrf.mxu1 }
 0x347   : > { %v2189_v19 = vpop.f32.mrf.mxu1 }
 0x348   : > { %v2190_v41 = vadd.f32 %v2189_v19, %v2188_v56  ;;  %v1773_v56 = vadd.f32 %v2187_v0, %v3227_v15  ;;  %v1762_v15 = vadd.f32 %v3221_v11, %v3233_v16  ;;  %v1902_v11 = vld [vmem:[%s3322_s7] sm:$0x7]  ;;  %v1915_v16 = vpop.permute.xlu1 %1914 }
 0x349   : > { %v2191_v44 = vpop.f32.mrf.mxu1 }
 0x34b   : > { %v2192_v46 = vpop.f32.mrf.mxu1 }
 0x34d   : > { %v2194_v40 = vpop.f32.mrf.mxu1 }
 0x34f   : > { %v2195_v48 = vpop.f32.mrf.mxu1 }
 0x350   : > { %v2196_v9 = vadd.f32 %v2195_v48, %v2194_v40  ;;  %v2181_v40 = vadd.f32 %v3229_v3, %v3225_v20 }
 0x351   : > { %v2197_v17 = vpop.f32.mrf.mxu1 }
 0x352   : > { %v1786_v6 = vadd.f32 %v2196_v9, %v3215_v37 }
 0x353   : > { %v2198_v13 = vpop.f32.mrf.mxu1 }
 0x355   : > { %v2228_v50 = vpop.f32.mrf.mxu1 }
 0x356   : > { %v1834_v51 = vadd.f32 %v2228_v50, %v1738_v14 }
 0x357   : > { %v1825_v23 = vpop.f32.mrf.mxu1 }
 0x358   : > { %v1826_v30 = vadd.f32 %v1825_v23, %v1730_v52  ;;  %v1889_v62 = vmax.f32 %v1834_v51, 0.0 }
 0x359   : > { %v2229_v22 = vpop.f32.mrf.mxu1 }
 0x35a   : > { %v1837_v57 = vadd.f32 %v2229_v22, %v1741_v35  ;;  %v1887_v33 = vmax.f32 %v1826_v30, 0.0  ;;  %v2193_v35 = vadd.f32 %v2192_v46, %v2191_v44  ;;  %v1778_v30 = vadd.f32 %v2190_v41, %v3217_v36 }
 0x35b   : > { %v1828_v61 = vpop.f32.mrf.mxu1  ;;  %v1770_v44 = vadd.f32 %v2184_v53, %v3223_v27  ;;  %v1765_v36 = vadd.f32 %v2181_v40, %v3237_v21 }
 0x35c   : > { %v1890_v34 = vmax.f32 %v1837_v57, 0.0  ;;  %v1829_v63 = vadd.f32 %v1828_v61, %v1733_v18  ;;  %v1781_v24 = vadd.f32 %v2193_v35, %v3219_v7 }
 0x35d   : > { %v2232_v32 = vpop.f32.mrf.mxu1 }
 0x35e   : > { %v3239_v58 = vpack.c.bf16 %v1890_v34, %v1889_v62  ;;  %v1888_v38 = vmax.f32 %v1829_v63, 0.0  ;;  %v1850_v59 = vadd.f32 %v2232_v32, %v1754_v60 }
 0x35f   : > { %v1841_v2 = vpop.f32.mrf.mxu1 }
 0x360   : > { %v3241_v31 = vpack.c.bf16 %v1888_v38, %v1887_v33  ;;  %v1842_v5 = vadd.f32 %v1841_v2, %v1746_v26  ;;  %v1893_v12 = vmax.f32 %v1850_v59, 0.0 }
 0x361   : > { %v2233_v42 = vpop.f32.mrf.mxu1 }
 0x362   : > { %v1853_v28 = vadd.f32 %v2233_v42, %v1757_v54  ;;  %v1891_v50 = vmax.f32 %v1842_v5, 0.0 }
 0x363   : > { %v1844_v47 = vpop.f32.mrf.mxu1 }
 0x364   : > { %v1894_v17 = vmax.f32 %v1853_v28, 0.0  ;;  %v1845_v8 = vadd.f32 %v1844_v47, %v1749_v10 }
 0x365   : > { %v2236_v13 = vpop.f32.mrf.mxu1 }
 0x366   : > { %v1906_v14 = vpack.c.bf16 %v1894_v17, %v1893_v12  ;;  %v1892_v4 = vmax.f32 %v1845_v8, 0.0  ;;  %v1866_v49 = vadd.f32 %v2236_v13, %v1770_v44 }
 0x367   : > { %v1857_v29 = vpop.f32.mrf.mxu1 }
 0x368   : > { %v1905_v23 = vpack.c.bf16 %v1892_v4, %v1891_v50  ;;  %v1897_v62 = vmax.f32 %v1866_v49, 0.0  ;;  %v1858_v34 = vadd.f32 %v1857_v29, %v1762_v15 }
 0x369   : > { %v2237_v51 = vpop.f32.mrf.mxu1 }
 0x36a   : > { %v1869_v46 = vadd.f32 %v2237_v51, %v1773_v56  ;;  %v1895_v32 = vmax.f32 %v1858_v34, 0.0 }
 0x36b   : > { %v1860_v52 = vpop.f32.mrf.mxu1 }
 0x36c   : > { %v1898_v3 = vmax.f32 %v1869_v46, 0.0  ;;  %v1861_v61 = vadd.f32 %v1860_v52, %v1765_v36 }
 0x36d   : > { %v2240_v43 = vpop.f32.mrf.mxu1 }
 0x36e   : > { %v1882_v1 = vadd.f32 %v2240_v43, %v1786_v6  ;;  %v1908_v27 = vpack.c.bf16 %v1898_v3, %v1897_v62  ;;  %v1896_v63 = vmax.f32 %v1861_v61, 0.0 }
 0x36f   : > { %v1873_v39 = vpop.f32.mrf.mxu1 }
 0x370   : > { %v1901_v22 = vmax.f32 %v1882_v1, 0.0  ;;  %v1874_v37 = vadd.f32 %v1873_v39, %v1778_v30  ;;  %v1907_v21 = vpack.c.bf16 %v1896_v63, %v1895_v32 }
 0x371   : > { %v2241_v48 = vpop.f32.mrf.mxu1 }
 0x372   : > { %v1910_v19 = vpack.c.bf16 %v1901_v22, %v1901_v22  ;;  %v1899_v18 = vmax.f32 %v1874_v37, 0.0 }
 0x373   : > { %v1876_v25 = vpop.f32.mrf.mxu1 }
 0x374   : > { %v1877_v57 = vadd.f32 %v1876_v25, %v1781_v24  ;;  %v1923_v45 = vsel %vm1921_vm5, %v1910_v19, 0 }
 0x375   : > { %2243 = vmatpush3.bf16.msra.mxu1 %v1923_v45 }
 0x376   : > { %v1900_v20 = vmax.f32 %v1877_v57, 0.0  ;;  %2244 = vmatprep.subr.bf16.mxu1 %v2458_v55 }
 0x378   : > { %v1909_v7 = vpack.c.bf16 %v1900_v20, %v1899_v18 }
 0x37a   : > { %2245 = vmatpush3.bf16.msra.mxu1 %v1909_v7 }
 0x37b   : > { %2246 = vmatprep.subr.bf16.mxu1 %v2458_v55 }
 0x37e   : > { %2247 = vmatpush3.bf16.msra.mxu1 %v1908_v27 }
 0x37f   : > { %2248 = vmatprep.subr.bf16.mxu1 %v2458_v55 }
 0x382   : > { %2249 = vmatpush3.bf16.msra.mxu1 %v1907_v21 }
 0x383   : > { %2250 = vmatprep.subr.bf16.mxu1 %v2458_v55 }
 0x386   : > { %2251 = vmatpush3.bf16.msra.mxu1 %v1906_v14 }
 0x387   : > { %2252 = vmatprep.subr.bf16.mxu1 %v2458_v55 }
 0x38a   : > { %2253 = vmatpush3.bf16.msra.mxu1 %v1905_v23 }
 0x38b   : > { %2254 = vmatprep.subr.bf16.mxu1 %v2458_v55 }
 0x38e   : > { %2255 = vmatpush3.bf16.msra.mxu1 %v3239_v58 }
 0x38f   : > { %2256 = vmatprep.subr.bf16.mxu1 %v2458_v55 }
 0x392   : > { %2257 = vmatpush3.bf16.msra.mxu1 %v3241_v31 }
 0x395   : > { %2259 = vmatmul.mubr.msk.bf16.vlgmr.msra.gmra.mxu1 %vm1917_vm6, %v1902_v11 }
 0x455   : > { %v1959_v33 = vpop.f32.mrf.mxu1 }
 0x456   : > { %v1960_v38 = vadd.f32 %v1959_v33, %v1915_v16 }
 0x457   : > { %v2260_v55 = vpop.f32.mrf.mxu1 }
 0x458   : > { %1965 = vst [vmem:[%s321_s28] sm:$0x3f] %v1960_v38 }
 0x459   : > { %v1962_v58 = vpop.f32.mrf.mxu1 }
 0x45a   : > { %2408 = shalt.err (!%p2405_p3)
}
 0x45b   : > { %s2409_s26 = scalar_lea.hbm %s3274_s17, 128  ;;  %s2413_s28 = scalar_lea.hbm %s3324_s9, 256 }
 0x45c   : > { %p2410_p4 = scmp.ne.s32.totalorder %s3274_s17, %s2409_s26  ;;  %p2414_p9 = scmp.lt.s32.totalorder %s3274_s17, %s3324_s9 }
 0x45d   : > { %p2415_p10 = scmp.lt.s32.totalorder %s2413_s28, %s2409_s26 }
 0x45e   : > { %p2411_p7 = pnand %p2410_p4, %p2549_p5 }
 0x45f   : > { %p2416_p11 = por %p2415_p10, %p2414_p9 }
 0x460   : > { %p2412_p8 = pneg %p2411_p7 }
 0x462   : > { %p2417_p12 = pnand %p2416_p11, %p2412_p8 }
 0x464   : > { %2420 = shalt.err (!%p2417_p12)
}
 0x465   : > { %2263 = dma.vmem_to_hbm [thread:$0]  (%p2549_p5), %s3276_s29, 128, %s3274_s17, %s1967_s21   ;;  %v2261_v60 = vpop.f32.mrf.mxu1 }
 0x466 PF: > { %p2269_p13 = scmp.ge.s32.totalorder %s2455_s12, 2  ;;  %s1992_s13 = sand.u32 1, %s2443_s30  }
 0x467   : > { %s1993_s22 = scalar_lea.sflag [#allocation3], %s1992_s13 }
 0x468   : > { %p2266_p0 = pnand %p2269_p13, %p2553_p6 }
 0x46a   : > { %p2267_p1 = pneg %p2266_p0 }
 0x46c   : > { %2438 = dma.done.wait (%p2267_p1), %s1993_s22, 128  }
 0x46d   : > { %2440 = vsyncadd (%p2267_p1), %s1993_s22, 4294967168  ;;  %p19_p2 = scmp.ge.s32.totalorder %s2536_s15, 4   ;;  %s3327_s30 = smov %s2447_s10 }
 0x46e   : > { %s3328_s10 = smov %s2451_s11  ;;  %s3329_s11 = smov %s2547_s18 }
 0x46f   : > { %s3330_s12 = smov %s2536_s15  ;;  %21 = sbr.rel (!%p19_p2) target bundleno = 3 (0x3), region = 91 }
 0x474   :  { %1998 = vsyncpa [#allocation3], 1 }
 0x475   :  { %2000 = vsyncpa [#allocation3 + $0x1], 1 }

</bundles_post_ra>
